<compile_context>
chip_gen: v7x
topology: tpu7x:2x2x1
jax: 0.10.0
libtpu: 0.0.40
codegen_flags: <defaults>
</compile_context>

<pallas_src>
import jax
import jax.numpy as jnp
from jax import lax
from jax.experimental import pallas as pl
from jax.experimental.pallas import tpu as pltpu

# ----------------------------- configuration --------------------------------
BATCH = 8          # args.batch_size
NUM_EDGES = 64     # args.num_edges
EDGE_DIM = 32      # args.edge_dim  (== args.direction_dim so embeddings can be added)
DIRECTION = 8      # args.direction
DIRECTION_DIM = 32 # args.direction_dim
SEQ_LEN = 10       # input trajectory length (sample_d index is in [5, 10))
PRE_LEN = 3        # args.pre_len

_VMEM = pl.BlockSpec(memory_space=pltpu.MemorySpace.VMEM)
_SMEM = pl.BlockSpec(memory_space=pltpu.MemorySpace.SMEM)


# --------------------------- fused Pallas kernel -----------------------------
def fused_forward_kernel(link_tab_ref,   # (E+1, D) f32  VMEM  (row 0 = padding)
                         dir_tab_ref,    # (DIR+1, D) f32 VMEM (row 0 = padding)
                         t_ref,          # (E, E) f32 VMEM : softmax(TM)*edge_A + I
                         xlogy_ref,      # (1,) f32 SMEM   : sum(xlogy(t, t))
                         inputs_ref,     # (B, S) i32 SMEM
                         dirs_ref,       # (B, S) i32 SMEM
                         pos_o_ref,      # (B,) i32 SMEM
                         pos_d_ref,      # (B,) i32 SMEM
                         loc_ref,        # (E, E) i32 SMEM : loc_dlabels_matrix
                         pred_ref,       # (B, E*PRE_LEN) f32 VMEM
                         loss_ref):      # (1,) f32 SMEM
    E = NUM_EDGES
    B = BATCH

    # W is loaded from VMEM once and reused by all three matmuls.
    W = link_tab_ref[pl.ds(1, E), :]                                 # (E, D)

    # ---- in-kernel scalar index math + embedding row gathers ----------------
    link_rows, dir_rows, head_rows, tail_rows, rel_rows = [], [], [], [], []
    for b in range(B):
        last_link = inputs_ref[b, SEQ_LEN - 1]
        last_dir = dirs_ref[b, SEQ_LEN - 1]
        so = inputs_ref[b, pos_o_ref[b]]          # sample_o edge id in [1, E]
        sd = inputs_ref[b, pos_d_ref[b]]          # sample_d edge id in [1, E]
        rel = loc_ref[so - 1, sd - 1] + 1         # relation id in [1, DIRECTION]
        link_rows.append(link_tab_ref[pl.ds(last_link, 1), :])
        dir_rows.append(dir_tab_ref[pl.ds(last_dir, 1), :])
        head_rows.append(link_tab_ref[pl.ds(so, 1), :])
        tail_rows.append(link_tab_ref[pl.ds(sd, 1), :])   # == W[sd-1]
        rel_rows.append(dir_tab_ref[pl.ds(rel, 1), :])
    link_e = jnp.concatenate(link_rows, axis=0)                      # (B, D)
    dir_e = jnp.concatenate(dir_rows, axis=0)                        # (B, D)
    head_e = jnp.concatenate(head_rows, axis=0)                      # (B, D)
    tail_e = jnp.concatenate(tail_rows, axis=0)                      # (B, D)
    rel_e = jnp.concatenate(rel_rows, axis=0)                        # (B, D)

    # ---- 1) KL loss:  KLDiv(softmax(W@W.T), softmax(TM)*edge_A + I) * 10 ----
    # Reference passes *probabilities* (not log-probs) to KLDivLoss, so the
    # pointwise term is xlogy(t, t) - t * p; sum(xlogy(t,t)) is precomputed in
    # glue (W-independent) and passed in via SMEM.
    recon = lax.dot_general(W, W, (((1,), (1,)), ((), ())),
                            preferred_element_type=jnp.float32)      # (E, E)
    m = jnp.max(recon, axis=-1, keepdims=True)
    e = jnp.exp(recon - m)
    p = e / jnp.sum(e, axis=-1, keepdims=True)
    kl_cross = jnp.sum(t_ref[...] * p)
    kl = (xlogy_ref[0] - kl_cross) * (10.0 / E)

    # ---- 2) TransE cross-entropy:  CE((head+rel) @ W.T, sample_d - 1) -------
    q = head_e + rel_e                                               # (B, D)
    scores = lax.dot_general(q, W, (((1,), (1,)), ((), ())),
                             preferred_element_type=jnp.float32)     # (B, E)
    sm = jnp.max(scores, axis=-1, keepdims=True)
    lse = jnp.log(jnp.sum(jnp.exp(scores - sm), axis=-1, keepdims=True)) + sm
    # target logit = q . W[sample_d - 1] = q . link_table[sample_d] (no one_hot)
    tgt = jnp.sum(q * tail_e, axis=-1, keepdims=True)                # (B, 1)
    ce = jnp.sum(lse - tgt) / B

    # ---- 3) similarity scores -> lane-dense tiled prediction ----------------
    sim = lax.dot_general(link_e + dir_e, W, (((1,), (1,)), ((), ())),
                          preferred_element_type=jnp.float32)        # (B, E)
    pred_ref[...] = jnp.concatenate([sim] * PRE_LEN, axis=1)         # (B, E*PRE_LEN)

    loss_ref[0] = kl + ce


def _fused_forward_call(link_table, dir_table, t, xlogy_sum,
                        inputs, directions, pos_o, pos_d, loc_dlabels):
    return pl.pallas_call(
        fused_forward_kernel,
        out_shape=(
            jax.ShapeDtypeStruct((BATCH, NUM_EDGES * PRE_LEN), jnp.float32),
            jax.ShapeDtypeStruct((1,), jnp.float32),
        ),
        in_specs=[_VMEM, _VMEM, _VMEM,                      # tables + KL target
                  _SMEM, _SMEM, _SMEM, _SMEM, _SMEM, _SMEM],  # scalars / indices
        out_specs=(_VMEM, _SMEM),
    )(link_table, dir_table, t, xlogy_sum, inputs, directions, pos_o, pos_d,
      loc_dlabels)


# --------------------------- model forward (glue) ----------------------------
@jax.jit
def rnn_forward(params, inputs, directions, mask, key):
    del mask  # unused in the reference forward
    link_table = params["link_emb"]          # (NUM_EDGES + 1, EDGE_DIM), row 0 = padding
    dir_table = params["dir_emb"]            # (DIRECTION + 1, DIRECTION_DIM), row 0 = padding
    TM = params["TM"]                        # (E, E)
    edge_A = params["edge_A"]                # (E, E) float {0, 1}
    loc_dlabels = params["loc_dlabels"]      # (E, E) int32

    # W-independent KL target hoisted out of the kernel (parameter-only; could
    # be cached across steps in a training loop).
    tmax = jnp.max(TM, axis=-1, keepdims=True)
    te = jnp.exp(TM - tmax)
    t = (te / jnp.sum(te, axis=-1, keepdims=True)) * edge_A \
        + jnp.eye(NUM_EDGES, dtype=jnp.float32)
    xlogy_sum = jnp.sum(
        jnp.where(t > 0.0, t * jnp.log(jnp.where(t > 0.0, t, 1.0)), 0.0))
    xlogy_sum = jnp.reshape(xlogy_sum, (1,)).astype(jnp.float32)

    # Sampled origin / destination positions (torch.randint in the reference).
    k_o, k_d, k_pd = jax.random.split(key, 3)
    pos_o = jax.random.randint(k_o, (BATCH,), 0, 5, dtype=jnp.int32)
    pos_d = jax.random.randint(k_d, (BATCH,), 5, 10, dtype=jnp.int32)

    # Single fused kernel: all matmuls, softmaxes, gathers, both losses, pred.
    # TODO(synk): if this forward were called per-timestep, batch steps and add
    # a "parallel" leading grid axis so both v7x TensorCores get work.
    pred, loss_vec = _fused_forward_call(
        link_table, dir_table, t, xlogy_sum,
        inputs, directions, pos_o, pos_d, loc_dlabels)
    loss = loss_vec[0]

    # pred_d is torch.rand in the reference.
    pred_d = jax.random.uniform(k_pd, (BATCH, DIRECTION * PRE_LEN),
                                dtype=jnp.float32)
    return pred, pred_d, loss


# ------------------------- pure-JAX reference (check) ------------------------
def rnn_forward_reference(params, inputs, directions, mask, key):
    del mask
    link_table = params["link_emb"]
    dir_table = params["dir_emb"]
    TM = params["TM"]
    edge_A = params["edge_A"]
    loc_dlabels = params["loc_dlabels"]
    hp = lax.Precision.HIGHEST

    W = link_table[1:, :]
    recon = jnp.dot(W, W.T, precision=hp)
    p = jax.nn.softmax(recon, axis=-1)
    t = jax.nn.softmax(TM, axis=-1) * edge_A + jnp.eye(NUM_EDGES, dtype=jnp.float32)
    xlogy = jnp.where(t > 0.0, t * jnp.log(jnp.where(t > 0.0, t, 1.0)), 0.0)
    loss = (jnp.sum(xlogy - t * p) / NUM_EDGES) * 10.0

    k_o, k_d, k_pd = jax.random.split(key, 3)
    pos_o = jax.random.randint(k_o, (BATCH,), 0, 5, dtype=jnp.int32)
    pos_d = jax.random.randint(k_d, (BATCH,), 5, 10, dtype=jnp.int32)
    rows = jnp.arange(BATCH)
    so = inputs[rows, pos_o]
    sd = inputs[rows, pos_d]
    head = link_table[so]
    rel = dir_table[loc_dlabels[so - 1, sd - 1] + 1]
    scores = jnp.dot(head + rel, W.T, precision=hp)
    lse = jax.nn.logsumexp(scores, axis=-1)
    ce = jnp.mean(lse - scores[rows, sd - 1])
    loss = loss + ce

    link_e = link_table[inputs[:, -1]]
    dir_e = dir_table[directions[:, -1]]
    sim = jnp.dot(link_e + dir_e, W.T, precision=hp)
    pred = jnp.tile(sim, (1, PRE_LEN))
    pred_d = jax.random.uniform(k_pd, (BATCH, DIRECTION * PRE_LEN),
                                dtype=jnp.float32)
    return pred, pred_d, loss


# ------------------------------- setup ---------------------------------------
def init_params(key):
    ks = jax.random.split(key, 5)
    link_emb = jax.random.normal(ks[0], (NUM_EDGES + 1, EDGE_DIM), jnp.float32)
    link_emb = link_emb.at[0].set(0.0)                     # padding_idx=0
    dir_emb = jax.random.normal(ks[1], (DIRECTION + 1, DIRECTION_DIM), jnp.float32)
    dir_emb = dir_emb.at[0].set(0.0)                       # padding_idx=0
    TM = jax.random.uniform(ks[2], (NUM_EDGES, NUM_EDGES), jnp.float32)
    edge_A = jax.random.bernoulli(ks[3], 0.3, (NUM_EDGES, NUM_EDGES)).astype(jnp.float32)
    loc_dlabels = jax.random.randint(ks[4], (NUM_EDGES, NUM_EDGES), 0, DIRECTION,
                                     dtype=jnp.int32)
    return {"link_emb": link_emb, "dir_emb": dir_emb, "TM": TM,
            "edge_A": edge_A, "loc_dlabels": loc_dlabels}


if __name__ == "__main__":
    root = jax.random.PRNGKey(0)
    k_param, k_in, k_dir, k_fwd = jax.random.split(root, 4)

    params = init_params(k_param)
    inputs = jax.random.randint(k_in, (BATCH, SEQ_LEN), 1, NUM_EDGES + 1,
                                dtype=jnp.int32)
    directions = jax.random.randint(k_dir, (BATCH, SEQ_LEN), 1, DIRECTION + 1,
                                    dtype=jnp.int32)
    mask = jnp.ones((BATCH, SEQ_LEN), jnp.float32)

    pred, pred_d, loss = rnn_forward(params, inputs, directions, mask, k_fwd)
    jax.block_until_ready((pred, pred_d, loss))

    assert pred.shape == (BATCH, NUM_EDGES * PRE_LEN)
    assert pred_d.shape == (BATCH, DIRECTION * PRE_LEN)
    assert loss.shape == ()
    assert bool(jnp.isfinite(loss))
    assert bool(jnp.all(jnp.isfinite(pred)))

    # Cross-check against a pure-JAX reference (same RNG path).
    ref_pred, _, ref_loss = jax.jit(rnn_forward_reference)(
        params, inputs, directions, mask, k_fwd)
    jax.block_until_ready((ref_pred, ref_loss))
    assert bool(jnp.allclose(pred, ref_pred, rtol=5e-2, atol=5e-2))
    assert bool(jnp.allclose(loss, ref_loss, rtol=5e-2, atol=5e-2))

    print("KERNEL_OK")
</pallas_src>

<mosaic_0001>
module attributes {stable_mosaic.version = 11 : i64} {
  func.func @fused_forward_kernel(%arg0: memref<65x32xf32, #tpu.memory_space<vmem>>, %arg1: memref<9x32xf32, #tpu.memory_space<vmem>>, %arg2: memref<64x64xf32, #tpu.memory_space<vmem>>, %arg3: memref<1xf32, #tpu.memory_space<smem>>, %arg4: memref<8x10xi32, #tpu.memory_space<smem>>, %arg5: memref<8x10xi32, #tpu.memory_space<smem>>, %arg6: memref<8xi32, #tpu.memory_space<smem>>, %arg7: memref<8xi32, #tpu.memory_space<smem>>, %arg8: memref<64x64xi32, #tpu.memory_space<smem>>, %arg9: memref<8x192xf32, #tpu.memory_space<vmem>>, %arg10: memref<1xf32, #tpu.memory_space<smem>>) attributes {dimension_semantics = [], scalar_prefetch = 0 : i64, scratch_operands = 0 : i64, tpu.core_type = #tpu.core_type<tc>} {
    %c1 = arith.constant 1 : index
    %c0 = arith.constant 0 : index
    %0 = vector.load %arg0[%c1, %c0] : memref<65x32xf32, #tpu.memory_space<vmem>>, vector<64x32xf32>
    %c0_0 = arith.constant 0 : index
    %c9 = arith.constant 9 : index
    %1 = memref.load %arg4[%c0_0, %c9] : memref<8x10xi32, #tpu.memory_space<smem>>
    %c0_1 = arith.constant 0 : index
    %c9_2 = arith.constant 9 : index
    %2 = memref.load %arg5[%c0_1, %c9_2] : memref<8x10xi32, #tpu.memory_space<smem>>
    %c0_3 = arith.constant 0 : index
    %3 = memref.load %arg6[%c0_3] : memref<8xi32, #tpu.memory_space<smem>>
    %c0_4 = arith.constant 0 : index
    %4 = arith.index_cast %3 : i32 to index
    %5 = memref.load %arg4[%c0_4, %4] : memref<8x10xi32, #tpu.memory_space<smem>>
    %c0_5 = arith.constant 0 : index
    %6 = memref.load %arg7[%c0_5] : memref<8xi32, #tpu.memory_space<smem>>
    %c0_6 = arith.constant 0 : index
    %7 = arith.index_cast %6 : i32 to index
    %8 = memref.load %arg4[%c0_6, %7] : memref<8x10xi32, #tpu.memory_space<smem>>
    %c1_i32 = arith.constant 1 : i32
    %9 = arith.subi %5, %c1_i32 : i32
    %c1_i32_7 = arith.constant 1 : i32
    %10 = arith.subi %8, %c1_i32_7 : i32
    %11 = arith.index_cast %9 : i32 to index
    %12 = arith.index_cast %10 : i32 to index
    %13 = memref.load %arg8[%11, %12] : memref<64x64xi32, #tpu.memory_space<smem>>
    %c1_i32_8 = arith.constant 1 : i32
    %14 = arith.addi %13, %c1_i32_8 : i32
    %15 = arith.index_cast %1 : i32 to index
    %c0_9 = arith.constant 0 : index
    %16 = vector.load %arg0[%15, %c0_9] : memref<65x32xf32, #tpu.memory_space<vmem>>, vector<1x32xf32>
    %17 = arith.index_cast %2 : i32 to index
    %c0_10 = arith.constant 0 : index
    %18 = vector.load %arg1[%17, %c0_10] : memref<9x32xf32, #tpu.memory_space<vmem>>, vector<1x32xf32>
    %19 = arith.index_cast %5 : i32 to index
    %c0_11 = arith.constant 0 : index
    %20 = vector.load %arg0[%19, %c0_11] : memref<65x32xf32, #tpu.memory_space<vmem>>, vector<1x32xf32>
    %21 = arith.index_cast %8 : i32 to index
    %c0_12 = arith.constant 0 : index
    %22 = vector.load %arg0[%21, %c0_12] : memref<65x32xf32, #tpu.memory_space<vmem>>, vector<1x32xf32>
    %23 = arith.index_cast %14 : i32 to index
    %c0_13 = arith.constant 0 : index
    %24 = vector.load %arg1[%23, %c0_13] : memref<9x32xf32, #tpu.memory_space<vmem>>, vector<1x32xf32>
    %c1_14 = arith.constant 1 : index
    %c9_15 = arith.constant 9 : index
    %25 = memref.load %arg4[%c1_14, %c9_15] : memref<8x10xi32, #tpu.memory_space<smem>>
    %c1_16 = arith.constant 1 : index
    %c9_17 = arith.constant 9 : index
    %26 = memref.load %arg5[%c1_16, %c9_17] : memref<8x10xi32, #tpu.memory_space<smem>>
    %c1_18 = arith.constant 1 : index
    %27 = memref.load %arg6[%c1_18] : memref<8xi32, #tpu.memory_space<smem>>
    %c1_19 = arith.constant 1 : index
    %28 = arith.index_cast %27 : i32 to index
    %29 = memref.load %arg4[%c1_19, %28] : memref<8x10xi32, #tpu.memory_space<smem>>
    %c1_20 = arith.constant 1 : index
    %30 = memref.load %arg7[%c1_20] : memref<8xi32, #tpu.memory_space<smem>>
    %c1_21 = arith.constant 1 : index
    %31 = arith.index_cast %30 : i32 to index
    %32 = memref.load %arg4[%c1_21, %31] : memref<8x10xi32, #tpu.memory_space<smem>>
    %c1_i32_22 = arith.constant 1 : i32
    %33 = arith.subi %29, %c1_i32_22 : i32
    %c1_i32_23 = arith.constant 1 : i32
    %34 = arith.subi %32, %c1_i32_23 : i32
    %35 = arith.index_cast %33 : i32 to index
    %36 = arith.index_cast %34 : i32 to index
    %37 = memref.load %arg8[%35, %36] : memref<64x64xi32, #tpu.memory_space<smem>>
    %c1_i32_24 = arith.constant 1 : i32
    %38 = arith.addi %37, %c1_i32_24 : i32
    %39 = arith.index_cast %25 : i32 to index
    %c0_25 = arith.constant 0 : index
    %40 = vector.load %arg0[%39, %c0_25] : memref<65x32xf32, #tpu.memory_space<vmem>>, vector<1x32xf32>
    %41 = arith.index_cast %26 : i32 to index
    %c0_26 = arith.constant 0 : index
    %42 = vector.load %arg1[%41, %c0_26] : memref<9x32xf32, #tpu.memory_space<vmem>>, vector<1x32xf32>
    %43 = arith.index_cast %29 : i32 to index
    %c0_27 = arith.constant 0 : index
    %44 = vector.load %arg0[%43, %c0_27] : memref<65x32xf32, #tpu.memory_space<vmem>>, vector<1x32xf32>
    %45 = arith.index_cast %32 : i32 to index
    %c0_28 = arith.constant 0 : index
    %46 = vector.load %arg0[%45, %c0_28] : memref<65x32xf32, #tpu.memory_space<vmem>>, vector<1x32xf32>
    %47 = arith.index_cast %38 : i32 to index
    %c0_29 = arith.constant 0 : index
    %48 = vector.load %arg1[%47, %c0_29] : memref<9x32xf32, #tpu.memory_space<vmem>>, vector<1x32xf32>
    %c2 = arith.constant 2 : index
    %c9_30 = arith.constant 9 : index
    %49 = memref.load %arg4[%c2, %c9_30] : memref<8x10xi32, #tpu.memory_space<smem>>
    %c2_31 = arith.constant 2 : index
    %c9_32 = arith.constant 9 : index
    %50 = memref.load %arg5[%c2_31, %c9_32] : memref<8x10xi32, #tpu.memory_space<smem>>
    %c2_33 = arith.constant 2 : index
    %51 = memref.load %arg6[%c2_33] : memref<8xi32, #tpu.memory_space<smem>>
    %c2_34 = arith.constant 2 : index
    %52 = arith.index_cast %51 : i32 to index
    %53 = memref.load %arg4[%c2_34, %52] : memref<8x10xi32, #tpu.memory_space<smem>>
    %c2_35 = arith.constant 2 : index
    %54 = memref.load %arg7[%c2_35] : memref<8xi32, #tpu.memory_space<smem>>
    %c2_36 = arith.constant 2 : index
    %55 = arith.index_cast %54 : i32 to index
    %56 = memref.load %arg4[%c2_36, %55] : memref<8x10xi32, #tpu.memory_space<smem>>
    %c1_i32_37 = arith.constant 1 : i32
    %57 = arith.subi %53, %c1_i32_37 : i32
    %c1_i32_38 = arith.constant 1 : i32
    %58 = arith.subi %56, %c1_i32_38 : i32
    %59 = arith.index_cast %57 : i32 to index
    %60 = arith.index_cast %58 : i32 to index
    %61 = memref.load %arg8[%59, %60] : memref<64x64xi32, #tpu.memory_space<smem>>
    %c1_i32_39 = arith.constant 1 : i32
    %62 = arith.addi %61, %c1_i32_39 : i32
    %63 = arith.index_cast %49 : i32 to index
    %c0_40 = arith.constant 0 : index
    %64 = vector.load %arg0[%63, %c0_40] : memref<65x32xf32, #tpu.memory_space<vmem>>, vector<1x32xf32>
    %65 = arith.index_cast %50 : i32 to index
    %c0_41 = arith.constant 0 : index
    %66 = vector.load %arg1[%65, %c0_41] : memref<9x32xf32, #tpu.memory_space<vmem>>, vector<1x32xf32>
    %67 = arith.index_cast %53 : i32 to index
    %c0_42 = arith.constant 0 : index
    %68 = vector.load %arg0[%67, %c0_42] : memref<65x32xf32, #tpu.memory_space<vmem>>, vector<1x32xf32>
    %69 = arith.index_cast %56 : i32 to index
    %c0_43 = arith.constant 0 : index
    %70 = vector.load %arg0[%69, %c0_43] : memref<65x32xf32, #tpu.memory_space<vmem>>, vector<1x32xf32>
    %71 = arith.index_cast %62 : i32 to index
    %c0_44 = arith.constant 0 : index
    %72 = vector.load %arg1[%71, %c0_44] : memref<9x32xf32, #tpu.memory_space<vmem>>, vector<1x32xf32>
    %c3 = arith.constant 3 : index
    %c9_45 = arith.constant 9 : index
    %73 = memref.load %arg4[%c3, %c9_45] : memref<8x10xi32, #tpu.memory_space<smem>>
    %c3_46 = arith.constant 3 : index
    %c9_47 = arith.constant 9 : index
    %74 = memref.load %arg5[%c3_46, %c9_47] : memref<8x10xi32, #tpu.memory_space<smem>>
    %c3_48 = arith.constant 3 : index
    %75 = memref.load %arg6[%c3_48] : memref<8xi32, #tpu.memory_space<smem>>
    %c3_49 = arith.constant 3 : index
    %76 = arith.index_cast %75 : i32 to index
    %77 = memref.load %arg4[%c3_49, %76] : memref<8x10xi32, #tpu.memory_space<smem>>
    %c3_50 = arith.constant 3 : index
    %78 = memref.load %arg7[%c3_50] : memref<8xi32, #tpu.memory_space<smem>>
    %c3_51 = arith.constant 3 : index
    %79 = arith.index_cast %78 : i32 to index
    %80 = memref.load %arg4[%c3_51, %79] : memref<8x10xi32, #tpu.memory_space<smem>>
    %c1_i32_52 = arith.constant 1 : i32
    %81 = arith.subi %77, %c1_i32_52 : i32
    %c1_i32_53 = arith.constant 1 : i32
    %82 = arith.subi %80, %c1_i32_53 : i32
    %83 = arith.index_cast %81 : i32 to index
    %84 = arith.index_cast %82 : i32 to index
    %85 = memref.load %arg8[%83, %84] : memref<64x64xi32, #tpu.memory_space<smem>>
    %c1_i32_54 = arith.constant 1 : i32
    %86 = arith.addi %85, %c1_i32_54 : i32
    %87 = arith.index_cast %73 : i32 to index
    %c0_55 = arith.constant 0 : index
    %88 = vector.load %arg0[%87, %c0_55] : memref<65x32xf32, #tpu.memory_space<vmem>>, vector<1x32xf32>
    %89 = arith.index_cast %74 : i32 to index
    %c0_56 = arith.constant 0 : index
    %90 = vector.load %arg1[%89, %c0_56] : memref<9x32xf32, #tpu.memory_space<vmem>>, vector<1x32xf32>
    %91 = arith.index_cast %77 : i32 to index
    %c0_57 = arith.constant 0 : index
    %92 = vector.load %arg0[%91, %c0_57] : memref<65x32xf32, #tpu.memory_space<vmem>>, vector<1x32xf32>
    %93 = arith.index_cast %80 : i32 to index
    %c0_58 = arith.constant 0 : index
    %94 = vector.load %arg0[%93, %c0_58] : memref<65x32xf32, #tpu.memory_space<vmem>>, vector<1x32xf32>
    %95 = arith.index_cast %86 : i32 to index
    %c0_59 = arith.constant 0 : index
    %96 = vector.load %arg1[%95, %c0_59] : memref<9x32xf32, #tpu.memory_space<vmem>>, vector<1x32xf32>
    %c4 = arith.constant 4 : index
    %c9_60 = arith.constant 9 : index
    %97 = memref.load %arg4[%c4, %c9_60] : memref<8x10xi32, #tpu.memory_space<smem>>
    %c4_61 = arith.constant 4 : index
    %c9_62 = arith.constant 9 : index
    %98 = memref.load %arg5[%c4_61, %c9_62] : memref<8x10xi32, #tpu.memory_space<smem>>
    %c4_63 = arith.constant 4 : index
    %99 = memref.load %arg6[%c4_63] : memref<8xi32, #tpu.memory_space<smem>>
    %c4_64 = arith.constant 4 : index
    %100 = arith.index_cast %99 : i32 to index
    %101 = memref.load %arg4[%c4_64, %100] : memref<8x10xi32, #tpu.memory_space<smem>>
    %c4_65 = arith.constant 4 : index
    %102 = memref.load %arg7[%c4_65] : memref<8xi32, #tpu.memory_space<smem>>
    %c4_66 = arith.constant 4 : index
    %103 = arith.index_cast %102 : i32 to index
    %104 = memref.load %arg4[%c4_66, %103] : memref<8x10xi32, #tpu.memory_space<smem>>
    %c1_i32_67 = arith.constant 1 : i32
    %105 = arith.subi %101, %c1_i32_67 : i32
    %c1_i32_68 = arith.constant 1 : i32
    %106 = arith.subi %104, %c1_i32_68 : i32
    %107 = arith.index_cast %105 : i32 to index
    %108 = arith.index_cast %106 : i32 to index
    %109 = memref.load %arg8[%107, %108] : memref<64x64xi32, #tpu.memory_space<smem>>
    %c1_i32_69 = arith.constant 1 : i32
    %110 = arith.addi %109, %c1_i32_69 : i32
    %111 = arith.index_cast %97 : i32 to index
    %c0_70 = arith.constant 0 : index
    %112 = vector.load %arg0[%111, %c0_70] : memref<65x32xf32, #tpu.memory_space<vmem>>, vector<1x32xf32>
    %113 = arith.index_cast %98 : i32 to index
    %c0_71 = arith.constant 0 : index
    %114 = vector.load %arg1[%113, %c0_71] : memref<9x32xf32, #tpu.memory_space<vmem>>, vector<1x32xf32>
    %115 = arith.index_cast %101 : i32 to index
    %c0_72 = arith.constant 0 : index
    %116 = vector.load %arg0[%115, %c0_72] : memref<65x32xf32, #tpu.memory_space<vmem>>, vector<1x32xf32>
    %117 = arith.index_cast %104 : i32 to index
    %c0_73 = arith.constant 0 : index
    %118 = vector.load %arg0[%117, %c0_73] : memref<65x32xf32, #tpu.memory_space<vmem>>, vector<1x32xf32>
    %119 = arith.index_cast %110 : i32 to index
    %c0_74 = arith.constant 0 : index
    %120 = vector.load %arg1[%119, %c0_74] : memref<9x32xf32, #tpu.memory_space<vmem>>, vector<1x32xf32>
    %c5 = arith.constant 5 : index
    %c9_75 = arith.constant 9 : index
    %121 = memref.load %arg4[%c5, %c9_75] : memref<8x10xi32, #tpu.memory_space<smem>>
    %c5_76 = arith.constant 5 : index
    %c9_77 = arith.constant 9 : index
    %122 = memref.load %arg5[%c5_76, %c9_77] : memref<8x10xi32, #tpu.memory_space<smem>>
    %c5_78 = arith.constant 5 : index
    %123 = memref.load %arg6[%c5_78] : memref<8xi32, #tpu.memory_space<smem>>
    %c5_79 = arith.constant 5 : index
    %124 = arith.index_cast %123 : i32 to index
    %125 = memref.load %arg4[%c5_79, %124] : memref<8x10xi32, #tpu.memory_space<smem>>
    %c5_80 = arith.constant 5 : index
    %126 = memref.load %arg7[%c5_80] : memref<8xi32, #tpu.memory_space<smem>>
    %c5_81 = arith.constant 5 : index
    %127 = arith.index_cast %126 : i32 to index
    %128 = memref.load %arg4[%c5_81, %127] : memref<8x10xi32, #tpu.memory_space<smem>>
    %c1_i32_82 = arith.constant 1 : i32
    %129 = arith.subi %125, %c1_i32_82 : i32
    %c1_i32_83 = arith.constant 1 : i32
    %130 = arith.subi %128, %c1_i32_83 : i32
    %131 = arith.index_cast %129 : i32 to index
    %132 = arith.index_cast %130 : i32 to index
    %133 = memref.load %arg8[%131, %132] : memref<64x64xi32, #tpu.memory_space<smem>>
    %c1_i32_84 = arith.constant 1 : i32
    %134 = arith.addi %133, %c1_i32_84 : i32
    %135 = arith.index_cast %121 : i32 to index
    %c0_85 = arith.constant 0 : index
    %136 = vector.load %arg0[%135, %c0_85] : memref<65x32xf32, #tpu.memory_space<vmem>>, vector<1x32xf32>
    %137 = arith.index_cast %122 : i32 to index
    %c0_86 = arith.constant 0 : index
    %138 = vector.load %arg1[%137, %c0_86] : memref<9x32xf32, #tpu.memory_space<vmem>>, vector<1x32xf32>
    %139 = arith.index_cast %125 : i32 to index
    %c0_87 = arith.constant 0 : index
    %140 = vector.load %arg0[%139, %c0_87] : memref<65x32xf32, #tpu.memory_space<vmem>>, vector<1x32xf32>
    %141 = arith.index_cast %128 : i32 to index
    %c0_88 = arith.constant 0 : index
    %142 = vector.load %arg0[%141, %c0_88] : memref<65x32xf32, #tpu.memory_space<vmem>>, vector<1x32xf32>
    %143 = arith.index_cast %134 : i32 to index
    %c0_89 = arith.constant 0 : index
    %144 = vector.load %arg1[%143, %c0_89] : memref<9x32xf32, #tpu.memory_space<vmem>>, vector<1x32xf32>
    %c6 = arith.constant 6 : index
    %c9_90 = arith.constant 9 : index
    %145 = memref.load %arg4[%c6, %c9_90] : memref<8x10xi32, #tpu.memory_space<smem>>
    %c6_91 = arith.constant 6 : index
    %c9_92 = arith.constant 9 : index
    %146 = memref.load %arg5[%c6_91, %c9_92] : memref<8x10xi32, #tpu.memory_space<smem>>
    %c6_93 = arith.constant 6 : index
    %147 = memref.load %arg6[%c6_93] : memref<8xi32, #tpu.memory_space<smem>>
    %c6_94 = arith.constant 6 : index
    %148 = arith.index_cast %147 : i32 to index
    %149 = memref.load %arg4[%c6_94, %148] : memref<8x10xi32, #tpu.memory_space<smem>>
    %c6_95 = arith.constant 6 : index
    %150 = memref.load %arg7[%c6_95] : memref<8xi32, #tpu.memory_space<smem>>
    %c6_96 = arith.constant 6 : index
    %151 = arith.index_cast %150 : i32 to index
    %152 = memref.load %arg4[%c6_96, %151] : memref<8x10xi32, #tpu.memory_space<smem>>
    %c1_i32_97 = arith.constant 1 : i32
    %153 = arith.subi %149, %c1_i32_97 : i32
    %c1_i32_98 = arith.constant 1 : i32
    %154 = arith.subi %152, %c1_i32_98 : i32
    %155 = arith.index_cast %153 : i32 to index
    %156 = arith.index_cast %154 : i32 to index
    %157 = memref.load %arg8[%155, %156] : memref<64x64xi32, #tpu.memory_space<smem>>
    %c1_i32_99 = arith.constant 1 : i32
    %158 = arith.addi %157, %c1_i32_99 : i32
    %159 = arith.index_cast %145 : i32 to index
    %c0_100 = arith.constant 0 : index
    %160 = vector.load %arg0[%159, %c0_100] : memref<65x32xf32, #tpu.memory_space<vmem>>, vector<1x32xf32>
    %161 = arith.index_cast %146 : i32 to index
    %c0_101 = arith.constant 0 : index
    %162 = vector.load %arg1[%161, %c0_101] : memref<9x32xf32, #tpu.memory_space<vmem>>, vector<1x32xf32>
    %163 = arith.index_cast %149 : i32 to index
    %c0_102 = arith.constant 0 : index
    %164 = vector.load %arg0[%163, %c0_102] : memref<65x32xf32, #tpu.memory_space<vmem>>, vector<1x32xf32>
    %165 = arith.index_cast %152 : i32 to index
    %c0_103 = arith.constant 0 : index
    %166 = vector.load %arg0[%165, %c0_103] : memref<65x32xf32, #tpu.memory_space<vmem>>, vector<1x32xf32>
    %167 = arith.index_cast %158 : i32 to index
    %c0_104 = arith.constant 0 : index
    %168 = vector.load %arg1[%167, %c0_104] : memref<9x32xf32, #tpu.memory_space<vmem>>, vector<1x32xf32>
    %c7 = arith.constant 7 : index
    %c9_105 = arith.constant 9 : index
    %169 = memref.load %arg4[%c7, %c9_105] : memref<8x10xi32, #tpu.memory_space<smem>>
    %c7_106 = arith.constant 7 : index
    %c9_107 = arith.constant 9 : index
    %170 = memref.load %arg5[%c7_106, %c9_107] : memref<8x10xi32, #tpu.memory_space<smem>>
    %c7_108 = arith.constant 7 : index
    %171 = memref.load %arg6[%c7_108] : memref<8xi32, #tpu.memory_space<smem>>
    %c7_109 = arith.constant 7 : index
    %172 = arith.index_cast %171 : i32 to index
    %173 = memref.load %arg4[%c7_109, %172] : memref<8x10xi32, #tpu.memory_space<smem>>
    %c7_110 = arith.constant 7 : index
    %174 = memref.load %arg7[%c7_110] : memref<8xi32, #tpu.memory_space<smem>>
    %c7_111 = arith.constant 7 : index
    %175 = arith.index_cast %174 : i32 to index
    %176 = memref.load %arg4[%c7_111, %175] : memref<8x10xi32, #tpu.memory_space<smem>>
    %c1_i32_112 = arith.constant 1 : i32
    %177 = arith.subi %173, %c1_i32_112 : i32
    %c1_i32_113 = arith.constant 1 : i32
    %178 = arith.subi %176, %c1_i32_113 : i32
    %179 = arith.index_cast %177 : i32 to index
    %180 = arith.index_cast %178 : i32 to index
    %181 = memref.load %arg8[%179, %180] : memref<64x64xi32, #tpu.memory_space<smem>>
    %c1_i32_114 = arith.constant 1 : i32
    %182 = arith.addi %181, %c1_i32_114 : i32
    %183 = arith.index_cast %169 : i32 to index
    %c0_115 = arith.constant 0 : index
    %184 = vector.load %arg0[%183, %c0_115] : memref<65x32xf32, #tpu.memory_space<vmem>>, vector<1x32xf32>
    %185 = arith.index_cast %170 : i32 to index
    %c0_116 = arith.constant 0 : index
    %186 = vector.load %arg1[%185, %c0_116] : memref<9x32xf32, #tpu.memory_space<vmem>>, vector<1x32xf32>
    %187 = arith.index_cast %173 : i32 to index
    %c0_117 = arith.constant 0 : index
    %188 = vector.load %arg0[%187, %c0_117] : memref<65x32xf32, #tpu.memory_space<vmem>>, vector<1x32xf32>
    %189 = arith.index_cast %176 : i32 to index
    %c0_118 = arith.constant 0 : index
    %190 = vector.load %arg0[%189, %c0_118] : memref<65x32xf32, #tpu.memory_space<vmem>>, vector<1x32xf32>
    %191 = arith.index_cast %182 : i32 to index
    %c0_119 = arith.constant 0 : index
    %192 = vector.load %arg1[%191, %c0_119] : memref<9x32xf32, #tpu.memory_space<vmem>>, vector<1x32xf32>
    %193 = tpu.concatenate %16, %40, %64, %88, %112, %136, %160, %184 in 0 : vector<1x32xf32>, vector<1x32xf32>, vector<1x32xf32>, vector<1x32xf32>, vector<1x32xf32>, vector<1x32xf32>, vector<1x32xf32>, vector<1x32xf32> -> vector<8x32xf32>
    %194 = tpu.concatenate %18, %42, %66, %90, %114, %138, %162, %186 in 0 : vector<1x32xf32>, vector<1x32xf32>, vector<1x32xf32>, vector<1x32xf32>, vector<1x32xf32>, vector<1x32xf32>, vector<1x32xf32>, vector<1x32xf32> -> vector<8x32xf32>
    %195 = tpu.concatenate %20, %44, %68, %92, %116, %140, %164, %188 in 0 : vector<1x32xf32>, vector<1x32xf32>, vector<1x32xf32>, vector<1x32xf32>, vector<1x32xf32>, vector<1x32xf32>, vector<1x32xf32>, vector<1x32xf32> -> vector<8x32xf32>
    %196 = tpu.concatenate %22, %46, %70, %94, %118, %142, %166, %190 in 0 : vector<1x32xf32>, vector<1x32xf32>, vector<1x32xf32>, vector<1x32xf32>, vector<1x32xf32>, vector<1x32xf32>, vector<1x32xf32>, vector<1x32xf32> -> vector<8x32xf32>
    %197 = tpu.concatenate %24, %48, %72, %96, %120, %144, %168, %192 in 0 : vector<1x32xf32>, vector<1x32xf32>, vector<1x32xf32>, vector<1x32xf32>, vector<1x32xf32>, vector<1x32xf32>, vector<1x32xf32>, vector<1x32xf32> -> vector<8x32xf32>
    %cst = arith.constant dense<0.000000e+00> : vector<64x64xf32>
    %198 = tpu.matmul %0, %0, %cst {dimension_numbers = #tpu.dot_dimension_numbers<[1], [1], [0], [0], [0, 0, 1, 0], [], []>} : vector<64x32xf32>, vector<64x32xf32>, vector<64x64xf32> -> vector<64x64xf32>
    %cst_120 = arith.constant dense<0xFF800000> : vector<64xf32>
    %199 = vector.multi_reduction <maximumf>, %198, %cst_120 [1] : vector<64x64xf32> to vector<64xf32>
    %200 = vector.shape_cast %199 : vector<64xf32> to vector<64x1xf32>
    %201 = vector.broadcast %200 : vector<64x1xf32> to vector<64x64xf32>
    %202 = arith.subf %198, %201 : vector<64x64xf32>
    %203 = math.exp %202 : vector<64x64xf32>
    %cst_121 = arith.constant dense<0.000000e+00> : vector<64xf32>
    %204 = vector.multi_reduction <add>, %203, %cst_121 [1] : vector<64x64xf32> to vector<64xf32>
    %205 = vector.shape_cast %204 : vector<64xf32> to vector<64x1xf32>
    %206 = vector.broadcast %205 : vector<64x1xf32> to vector<64x64xf32>
    %207 = arith.divf %203, %206 : vector<64x64xf32>
    %c0_122 = arith.constant 0 : index
    %c0_123 = arith.constant 0 : index
    %208 = vector.load %arg2[%c0_122, %c0_123] : memref<64x64xf32, #tpu.memory_space<vmem>>, vector<64x64xf32>
    %209 = arith.mulf %208, %207 : vector<64x64xf32>
    %210 = vector.shape_cast %209 : vector<64x64xf32> to vector<1x64x64xf32>
    %cst_124 = arith.constant dense<0.000000e+00> : vector<1xf32>
    %211 = vector.multi_reduction <add>, %210, %cst_124 [1, 2] : vector<1x64x64xf32> to vector<1xf32>
    %212 = vector.shape_cast %211 : vector<1xf32> to vector<1x1x1xf32>
    %213 = vector.extract %212[0, 0, 0] : f32 from vector<1x1x1xf32>
    %c0_125 = arith.constant 0 : index
    %214 = memref.load %arg3[%c0_125] : memref<1xf32, #tpu.memory_space<smem>>
    %215 = arith.subf %214, %213 : f32
    %cst_126 = arith.constant 1.562500e-01 : f32
    %216 = arith.mulf %215, %cst_126 : f32
    %217 = arith.addf %195, %197 : vector<8x32xf32>
    %cst_127 = arith.constant dense<0.000000e+00> : vector<8x64xf32>
    %218 = tpu.matmul %217, %0, %cst_127 {dimension_numbers = #tpu.dot_dimension_numbers<[1], [1], [0], [0], [0, 0, 1, 0], [], []>} : vector<8x32xf32>, vector<64x32xf32>, vector<8x64xf32> -> vector<8x64xf32>
    %cst_128 = arith.constant dense<0xFF800000> : vector<8xf32>
    %219 = vector.multi_reduction <maximumf>, %218, %cst_128 [1] : vector<8x64xf32> to vector<8xf32>
    %220 = vector.shape_cast %219 : vector<8xf32> to vector<8x1xf32>
    %221 = vector.broadcast %220 : vector<8x1xf32> to vector<8x64xf32>
    %222 = arith.subf %218, %221 : vector<8x64xf32>
    %223 = math.exp %222 : vector<8x64xf32>
    %cst_129 = arith.constant dense<0.000000e+00> : vector<8xf32>
    %224 = vector.multi_reduction <add>, %223, %cst_129 [1] : vector<8x64xf32> to vector<8xf32>
    %225 = vector.shape_cast %224 : vector<8xf32> to vector<8x1xf32>
    %226 = math.log %225 : vector<8x1xf32>
    %227 = arith.addf %226, %220 : vector<8x1xf32>
    %228 = arith.mulf %217, %196 : vector<8x32xf32>
    %cst_130 = arith.constant dense<0.000000e+00> : vector<8xf32>
    %229 = vector.multi_reduction <add>, %228, %cst_130 [1] : vector<8x32xf32> to vector<8xf32>
    %230 = vector.shape_cast %229 : vector<8xf32> to vector<8x1xf32>
    %231 = arith.subf %227, %230 : vector<8x1xf32>
    %232 = vector.shape_cast %231 : vector<8x1xf32> to vector<1x8x1xf32>
    %cst_131 = arith.constant dense<0.000000e+00> : vector<1xf32>
    %233 = vector.multi_reduction <add>, %232, %cst_131 [1, 2] : vector<1x8x1xf32> to vector<1xf32>
    %234 = vector.shape_cast %233 : vector<1xf32> to vector<1x1x1xf32>
    %235 = vector.extract %234[0, 0, 0] : f32 from vector<1x1x1xf32>
    %cst_132 = arith.constant 8.000000e+00 : f32
    %236 = arith.divf %235, %cst_132 : f32
    %237 = arith.addf %193, %194 : vector<8x32xf32>
    %cst_133 = arith.constant dense<0.000000e+00> : vector<8x64xf32>
    %238 = tpu.matmul %237, %0, %cst_133 {dimension_numbers = #tpu.dot_dimension_numbers<[1], [1], [0], [0], [0, 0, 1, 0], [], []>} : vector<8x32xf32>, vector<64x32xf32>, vector<8x64xf32> -> vector<8x64xf32>
    %239 = tpu.concatenate %238, %238, %238 in 1 : vector<8x64xf32>, vector<8x64xf32>, vector<8x64xf32> -> vector<8x192xf32>
    %c0_134 = arith.constant 0 : index
    %c0_135 = arith.constant 0 : index
    %240 = vector.load %arg9[%c0_134, %c0_135] : memref<8x192xf32, #tpu.memory_space<vmem>>, vector<8x192xf32>
    tpu.vector_store %arg9[%c0_134, %c0_135], %239 {strides = array<i32>} : memref<8x192xf32, #tpu.memory_space<vmem>>, vector<8x192xf32>,
    %241 = arith.addf %216, %236 : f32
    %c0_136 = arith.constant 0 : index
    %242 = memref.load %arg10[%c0_136] : memref<1xf32, #tpu.memory_space<smem>>
    memref.store %241, %arg10[%c0_136] : memref<1xf32, #tpu.memory_space<smem>>
    return
  }
}

</mosaic_0001>

<bundles_post_ra>
// kernel: rnn_forward.3
= control target key start
LH: loop header
LB: loop body
LE: loop exit
PB: predicated region body
PF: predicated region fallthrough
CT: control target
= control target key end

     0   :  { %s2256_s0 = inlined_call_operand.vmem [shape: f32[65,32], index: 0, kind: input, shape index: {}]   ;;  %s2257_s1 = inlined_call_operand.vmem [shape: f32[9,32], index: 1, kind: input, shape index: {}]   ;;  %s2258_s2 = inlined_call_operand.vmem [shape: f32[64,64], index: 2, kind: input, shape index: {}]   ;;  %s2259_s3 = inlined_call_operand.<no memory space> [shape: f32[1], index: 3, kind: input, shape index: {}]   ;;  %s2260_s4 = inlined_call_operand.vmem [shape: s32[8,10], index: 4, kind: input, shape index: {}]   ;;  %s2261_s5 = inlined_call_operand.vmem [shape: s32[8,10], index: 5, kind: input, shape index: {}]   ;;  %s2262_s6 = inlined_call_operand.vmem [shape: s32[8], index: 6, kind: input, shape index: {}]   ;;  %s2263_s7 = inlined_call_operand.vmem [shape: s32[8], index: 7, kind: input, shape index: {}]   ;;  %s2264_s8 = inlined_call_operand.vmem [shape: s32[64,64], index: 8, kind: input, shape index: {}]   ;;  %s2265_s9 = inlined_call_operand.hbm [shape: f32[8,192], index: 9, kind: output, shape index: {0}]   ;;  %s2266_s10 = inlined_call_operand.hbm [shape: f32[1], index: 10, kind: output, shape index: {1}]  }
   0x1   :  { %2280 = sst [smem:[#allocation30_spill]] %s2258_s2 }
   0x2   :  { %2281 = sst [smem:[#allocation31_spill]] %s2259_s3 }
   0x3   :  { %2282 = sst [smem:[#allocation32_spill]] %s2265_s9 }
   0x4   :  { %2283 = sst [smem:[#allocation33_spill]] %s2266_s10 }
   0x5   :  { %17 = vsyncpa [#allocation6], 0 }
   0x6   :  { %18 = vsyncpa [#allocation8], 0 }
   0x7   :  { %19 = vsyncpa [#allocation11], 0 }
   0x8   :  { %20 = vsyncpa [#allocation4], 0  ;;  %s46_s15 = sshll.u32 %s2261_s5, 4  ;;  %s47_s15 = int_to_ptr.vmem [resolvable:$true] %s46_s15 }
   0x9   :  { %21 = vsyncpa [#allocation5], 0  ;;  %s66_s18 = sshll.u32 %s2263_s7, 4  ;;  %s1443_s19 = scalar_lea.vmem %s47_s15, 128  ;;  %s67_s18 = int_to_ptr.vmem [resolvable:$true] %s66_s18 }
   0xa   :  { %p1444_p0 = scmp.ne.s32.totalorder %s47_s15, %s1443_s19  ;;  %p1448_p1 = scmp.lt.s32.totalorder %s47_s15, %s47_s15 }
   0xb   :  { %p1449_p2 = scmp.lt.s32.totalorder %s1443_s19, %s1443_s19 }
   0xd   :  { %p1450_p3 = por %p1449_p2, %p1448_p1 }
   0xf   :  { %p1451_p4 = pnand %p1450_p3, %p1444_p0 }
  0x11   :  { %1454 = shalt.err (!%p1451_p4)
}
  0x12   :  { %s1545_s20 = smov [#allocation7]   ;;  %s1455_s21 = scalar_lea.vmem %s67_s18, 16 }
  0x13   :  { %49 = dma.vmem_to_smem %s47_s15, 128, %s1545_s20, [#allocation8]  }
  0x14   :  { %p1456_p5 = scmp.ne.s32.totalorder %s67_s18, %s1455_s21  ;;  %p1460_p6 = scmp.lt.s32.totalorder %s67_s18, %s67_s18 }
  0x15   :  { %p1461_p7 = scmp.lt.s32.totalorder %s1455_s21, %s1455_s21 }
  0x17   :  { %p1462_p8 = por %p1461_p7, %p1460_p6 }
  0x19   :  { %p1463_p9 = pnand %p1462_p8, %p1456_p5 }
  0x1b   :  { %1466 = shalt.err (!%p1463_p9)
}
  0x1c   :  { %s1546_s5 = smov [#allocation10]   ;;  %s36_s23 = sshll.u32 %s2260_s4, 4  ;;  %s37_s23 = int_to_ptr.vmem [resolvable:$true] %s36_s23 }
  0x1d   :  { %69 = dma.vmem_to_smem %s67_s18, 16, %s1546_s5, [#allocation11]  }
  0x1e   :  { %s56_s26 = sshll.u32 %s2262_s6, 4  ;;  %s1467_s27 = scalar_lea.vmem %s37_s23, 128  ;;  %s57_s26 = int_to_ptr.vmem [resolvable:$true] %s56_s26 }
  0x1f   :  { %p1468_p10 = scmp.ne.s32.totalorder %s37_s23, %s1467_s27  ;;  %p1472_p11 = scmp.lt.s32.totalorder %s37_s23, %s37_s23 }
  0x20   :  { %p1473_p12 = scmp.lt.s32.totalorder %s1467_s27, %s1467_s27 }
  0x22   :  { %p1474_p13 = por %p1473_p12, %p1472_p11 }
  0x24   :  { %p1475_p0 = pnand %p1474_p13, %p1468_p10 }
  0x26   :  { %1478 = shalt.err (!%p1475_p0)
}
  0x27   :  { %s1547_s28 = smov [#allocation3]   ;;  %s1479_s29 = scalar_lea.vmem %s57_s26, 16 }
  0x28   :  { %39 = dma.vmem_to_smem %s37_s23, 128, %s1547_s28, [#allocation6]  }
  0x29   :  { %p1480_p1 = scmp.ne.s32.totalorder %s57_s26, %s1479_s29  ;;  %p1484_p2 = scmp.lt.s32.totalorder %s57_s26, %s57_s26 }
  0x2a   :  { %p1485_p3 = scmp.lt.s32.totalorder %s1479_s29, %s1479_s29 }
  0x2c   :  { %p1486_p4 = por %p1485_p3, %p1484_p2 }
  0x2e   :  { %p1487_p5 = pnand %p1486_p4, %p1480_p1 }
  0x30   :  { %1490 = shalt.err (!%p1487_p5)
}
  0x31   :  { %s1548_s4 = smov [#allocation9]   ;;  %s75_s11 = sshll.u32 %s2264_s8, 4  ;;  %s76_s11 = int_to_ptr.vmem [resolvable:$true] %s75_s11 }
  0x32   :  { %59 = dma.vmem_to_smem %s57_s26, 16, %s1548_s4, [#allocation8]  }
  0x33   :  { %s1491_s12 = scalar_lea.vmem %s76_s11, 1024  ;;  %p1496_p7 = scmp.lt.s32.totalorder %s76_s11, %s76_s11 }
  0x34   :  { %p1492_p6 = scmp.ne.s32.totalorder %s76_s11, %s1491_s12  ;;  %p1497_p8 = scmp.lt.s32.totalorder %s1491_s12, %s1491_s12 }
  0x36   :  { %p1498_p9 = por %p1497_p8, %p1496_p7 }
  0x38   :  { %p1499_p10 = pnand %p1498_p9, %p1492_p6 }
  0x3a   :  { %1502 = shalt.err (!%p1499_p10)
}
  0x3b   :  { %s1549_s13 = smov [#allocation12]   ;;  %s1550_s14 = smov 128  }
  0x3c   :  { %s1551_s15 = smov 8  }
  0x3d   :  { %81 = dma.vmem_to_smem %s76_s11, 1024, %s1549_s13, [#allocation11], %s1550_s14, %s1550_s14, %s1551_s15  }
  0x3e   :  { %1535 = dma.done.wait [#allocation6], 128  }
  0x3f   :  { %1536 = vsyncadd [#allocation6], 4294967168 }
  0x40   :  { %1537 = dma.done.wait [#allocation8], 144  }
  0x41   :  { %1538 = vsyncadd [#allocation8], 4294967152 }
  0x42   :  { %1539 = dma.done.wait [#allocation11], 1040  }
  0x43   :  { %1540 = vsyncadd [#allocation11], 4294966256 }
  0x44   :  { %97 = sfence }
  0x45   :  { %v98_v0 = vld [vmem:[%s2256_s0 + $0x1] sm:$0xff]  ;;  %v1634_v1 = vld [vmem:[%s2256_s0 + $0x9] sm:$0xff]  ;;  %vm567_vm0 = vcmask 261120   ;;  %v1639_v2 = vld [vmem:[%s2256_s0 + $0x11] sm:$0xff]  ;;  %v1552_v6 = vmov 0.0|0.0   ;;  %s108_s7 = sld [smem:[#allocation9]] }
  0x46   :  { %v1642_v3 = vpack.c.bf16 %v1634_v1, %v98_v0  ;;  %vm1646_vm1 = vmpackc.low %vm567_vm0, %vm567_vm0  ;;  %v1653_v5 = vld [vmem:[%s2256_s0 + $0x19] sm:$0xff]  ;;  %1358 = vmatprep.subr.bf16.mxu1 %v1552_v6  ;;  %1284 = vmatprep.mubr.msk.f32.mxu0 %vm567_vm0, %v98_v0  ;;  %vm1553_vm2 = vmmov 0   ;;  %v1554_v8 = vmov 0.0   ;;  %s110_s22 = sld [smem:[#allocation10]]  ;;  %s1669_s23 = sld [smem:[#allocation9 + $0x1]]  ;;  %v1683_v9 = vld [vmem:[%s2256_s0 + $0x21] sm:$0xff] }
  0x47   :  { %v1659_v7 = vpack.c.bf16 %v1653_v5, %v1639_v2  ;;  %1312 = vmatprep.mubr.msk.f32.mxu1 %vm1553_vm2, %v1554_v8  ;;  %s1671_s24 = sld [smem:[#allocation10 + $0x1]]  ;;  %v1688_v10 = vld [vmem:[%s2256_s0 + $0x29] sm:$0xff]  ;;  %s1699_s30 = sld [smem:[#allocation9 + $0x2]]  ;;  %v1721_v12 = vld [vmem:[%s2256_s0 + $0x31] sm:$0xff]  ;;  %v1726_v13 = vld [vmem:[%s2256_s0 + $0x39] sm:$0xff]  ;;  %vm441_vm3 = vcmask 1040384  }
  0x48   :  { %1336 = vmatprep.subr.msk.bf16.mxu0 %vm1646_vm1, %v1642_v3  ;;  %1361 = vmatpush3.bf16.xpose.msk.msra.mxu1 %vm1646_vm1, %v1642_v3  ;;  %v1696_v11 = vpack.c.bf16 %v1688_v10, %v1683_v9  ;;  %s1705_s14 = sld [smem:[#allocation10 + $0x2]]  ;;  %s1716_s17 = sld [smem:[#allocation9 + $0x3]]  ;;  %v1732_v14 = vpack.c.bf16 %v1726_v13, %v1721_v12  ;;  %vm443_vm4 = vcmask 1041408   ;;  %vm445_vm5 = vcmask 1042432  }
  0x49   :  { %1339 = vmatpush3.bf16.xpose.msk.msra.mxu0 %vm1646_vm1, %v1642_v3  ;;  %1362 = vmatprep.subr.bf16.mxu1 %v1552_v6  ;;  %s1734_s28 = sld [smem:[#allocation10 + $0x3]]  ;;  %vm447_vm6 = vcmask 1043456   ;;  %vm449_vm7 = vcmask 1044480   ;;  %vm451_vm8 = vcmask 1045504   ;;  %vm453_vm9 = vcmask 1046528  }
  0x4a   :  { %1342 = vmatprep.subr.msk.bf16.mxu0 %vm1646_vm1, %v1659_v7  ;;  %vm697_vm10 = vcmask 523264   ;;  %vm920_vm11 = vcmask 7168  }
  0x4b   :  { %s1690_s29 = sld [smem:[#allocation3 + %s108_s7]] }
  0x4c   :  { %s1692_s4 = sld [smem:[#allocation3 + %s110_s22]]  ;;  %s136_s6 = sshra.s32 %s1669_s23, 7 }
  0x4d   :  { %s1206_s11 = sshll.u32 %s136_s6, 7  ;;  %s145_s12 = sshra.s32 %s1671_s24, 7 }
  0x4e   :  { %s1208_s13 = sshll.u32 %s145_s12, 7  ;;  %s1207_s15 = sadd.s32 128, %s1206_s11 }
  0x4f   :  { %s141_s8 = sand.u32 127, %s1669_s23  ;;  %s1209_s7 = sadd.s32 128, %s1208_s13 }
  0x50   :  { %1365 = vmatpush3.bf16.xpose.msk.msra.mxu1 %vm1646_vm1, %v1659_v7  ;;  %s142_s23 = sadd.s32 %s1207_s15, %s141_s8  ;;  %s150_s26 = sand.u32 127, %s1671_s24 }
  0x51   :  { %2286 = sst [smem:[#allocation20_spill]] %s1690_s29  ;;  %1345 = vmatpush3.bf16.xpose.msk.msra.mxu0 %vm1646_vm1, %v1659_v7  ;;  %1366 = vmatprep.subr.bf16.mxu1 %v1552_v6  ;;  %s1098_s16 = sadd.s32 4294967295, %s1690_s29 }
  0x52   :  { %2287 = sst [smem:[#allocation21_spill]] %s1692_s4  ;;  %1348 = vmatprep.subr.msk.bf16.mxu0 %vm1646_vm1, %v1696_v11  ;;  %s1099_s5 = sadd.s32 4294967295, %s1692_s4 }
  0x53   :  { %s114_s22 = sshra.s32 %s1099_s5, 7  ;;  %s151_s27 = sadd.s32 %s1209_s7, %s150_s26 }
  0x54   :  { %s116_s25 = sadd.s32 %s1098_s16, %s114_s22  ;;  %s119_s6 = sand.u32 127, %s1099_s5 }
  0x55   :  { %s1736_s11 = sld [smem:[#allocation3 + %s142_s23]]  ;;  %s1100_s12 = sshll.u32 %s116_s25, 7 }
  0x56   :  { %s177_s13 = sshra.s32 %s1699_s30, 7  ;;  %s1746_s24 = sld [smem:[#allocation3 + %s151_s27]] }
  0x57   :  { %s1748_s15 = sld [smem:[#allocation9 + $0x4]]  ;;  %s1210_s8 = sshll.u32 %s177_s13, 7 }
  0x58   :  { %1369 = vmatpush3.bf16.xpose.msk.msra.mxu1 %vm1646_vm1, %v1696_v11  ;;  %s1753_s16 = sld [smem:[#allocation10 + $0x4]]  ;;  %s120_s18 = sadd.s32 %s1100_s12, %s119_s6 }
  0x59   :  { %1351 = vmatpush3.bf16.xpose.msk.msra.mxu0 %vm1646_vm1, %v1696_v11  ;;  %1370 = vmatprep.subr.bf16.mxu1 %v1552_v6  ;;  %s186_s19 = sshra.s32 %s1705_s14, 7  ;;  %s1211_s20 = sadd.s32 256, %s1210_s8 }
  0x5a   :  { %1354 = vmatprep.subr.msk.bf16.mxu0 %vm1646_vm1, %v1732_v14  ;;  %s182_s21 = sand.u32 127, %s1699_s30  ;;  %s1212_s5 = sshll.u32 %s186_s19, 7 }
  0x5b   :  { %s1757_s7 = sld [smem:[#allocation9 + $0x5]]  ;;  %s183_s13 = sadd.s32 %s1211_s20, %s182_s21 }
  0x5c   :  { %2288 = sst [smem:[#allocation22_spill]] %s1746_s24  ;;  %s1763_s26 = sld [smem:[#allocation10 + $0x5]] }
  0x5d   :  { %s1765_s27 = sld [smem:[#allocation12 + %s120_s18]]  ;;  %s1108_s30 = sadd.s32 4294967295, %s1736_s11 }
  0x5e   :  { %s1213_s6 = sadd.s32 256, %s1212_s5  ;;  %s1109_s12 = sadd.s32 4294967295, %s1746_s24 }
  0x5f   :  { %s191_s8 = sand.u32 127, %s1705_s14  ;;  %s1776_s19 = sld [smem:[#allocation3 + %s183_s13]] }
  0x60   :  { %1373 = vmatpush3.bf16.xpose.msk.msra.mxu1 %vm1646_vm1, %v1732_v14  ;;  %s192_s22 = sadd.s32 %s1213_s6, %s191_s8  ;;  %s155_s25 = sshra.s32 %s1109_s12, 7 }
  0x61   :  { %1357 = vmatpush3.bf16.xpose.msk.msra.mxu0 %vm1646_vm1, %v1732_v14  ;;  %s1783_s23 = sld [smem:[#allocation3 + %s192_s22]]  ;;  %s218_s5 = sshra.s32 %s1716_s17, 7 }
  0x62   :  { %1374 = vmatprep.subr.bf16.mxu0 %v1552_v6  ;;  %s1214_s10 = sshll.u32 %s218_s5, 7  ;;  %s223_s3 = sand.u32 127, %s1716_s17 }
  0x63   :  { %2289 = sst [smem:[#allocation23_spill]] %s1765_s27  ;;  %s1215_s9 = sadd.s32 384, %s1214_s10 }
  0x64   :  { %s227_s14 = sshra.s32 %s1734_s28, 7  ;;  %s157_s13 = sadd.s32 %s1108_s30, %s155_s25 }
  0x65   :  { %2290 = sst [smem:[#allocation24_spill]] %s1776_s19  ;;  %s1216_s2 = sshll.u32 %s227_s14, 7 }
  0x66   :  { %s160_s6 = sand.u32 127, %s1109_s12  ;;  %s224_s8 = sadd.s32 %s1215_s9, %s223_s3 }
  0x67   :  { %2291 = sst [smem:[#allocation25_spill]] %s1783_s23  ;;  %s1119_s22 = sadd.s32 4294967295, %s1783_s23 }
  0x68   :  { %1285 = vmatmul.mubr.msk.f32.vlgmr.msra.gmra.mrb[0].mxu0 %vm567_vm0, %v1634_v1  ;;  %s1217_s18 = sadd.s32 384, %s1216_s2  ;;  %s1110_s10 = sshll.u32 %s157_s13, 7 }
  0x69   :  { %1287 = vmatprep.mubr.msk.f32.mxu0 %vm567_vm0, %v1639_v2  ;;  %1377 = vmatpush3.bf16.xpose.msk.msra.mxu0 %vm1646_vm1, %v1642_v3  ;;  %s1118_s17 = sadd.s32 4294967295, %s1776_s19  ;;  %s1798_s25 = sld [smem:[#allocation3 + %s224_s8]] }
  0x6a   :  { %1378 = vmatprep.subr.bf16.mxu0 %v1552_v6  ;;  %s232_s30 = sand.u32 127, %s1734_s28  ;;  %s196_s3 = sshra.s32 %s1119_s22, 7 }
  0x6b   :  { %s233_s9 = sadd.s32 %s1217_s18, %s232_s30  ;;  %s161_s14 = sadd.s32 %s1110_s10, %s160_s6 }
  0x6c   :  { %1288 = vmatmul.mubr.msk.f32.gmra.mrb[2].mxu0 %vm567_vm0, %v1653_v5  ;;  %s1809_s5 = sld [smem:[#allocation3 + %s233_s9]]  ;;  %s201_s13 = sand.u32 127, %s1119_s22 }
  0x6d   :  { %1290 = vmatprep.mubr.msk.f32.mxu0 %vm567_vm0, %v1683_v9  ;;  %s198_s28 = sadd.s32 %s1118_s17, %s196_s3  ;;  %s259_s8 = sshra.s32 %s1748_s15, 7 }
  0x6e   :  { %s1218_s21 = sshll.u32 %s259_s8, 7  ;;  %s264_s18 = sand.u32 127, %s1748_s15 }
  0x6f   :  { %s1219_s30 = sadd.s32 512, %s1218_s21  ;;  %s268_s4 = sshra.s32 %s1753_s16, 7 }
  0x70   :  { %1291 = vmatmul.mubr.msk.f32.gmra.mrb[4].mxu0 %vm567_vm0, %v1688_v10  ;;  %s1120_s6 = sshll.u32 %s198_s28, 7  ;;  %s265_s22 = sadd.s32 %s1219_s30, %s264_s18 }
  0x71   :  { %1293 = vmatprep.mubr.msk.f32.mxu0 %vm567_vm0, %v1721_v12  ;;  %1381 = vmatpush3.bf16.xpose.msk.msra.mxu0 %vm1646_vm1, %v1659_v7  ;;  %s1220_s17 = sshll.u32 %s268_s4, 7  ;;  %s1128_s15 = sadd.s32 4294967295, %s1798_s25 }
  0x72   :  { %2292 = sst [smem:[#allocation26_spill]] %s1809_s5  ;;  %1382 = vmatprep.subr.bf16.mxu0 %v1552_v6  ;;  %s1129_s10 = sadd.s32 4294967295, %s1809_s5 }
  0x73   :  { %s237_s3 = sshra.s32 %s1129_s10, 7  ;;  %s1826_s9 = sld [smem:[#allocation12 + %s161_s14]] }
  0x74   :  { %1294 = vmatmul.mubr.msk.f32.gmra.mrb[6].mxu0 %vm567_vm0, %v1726_v13  ;;  %s202_s21 = sadd.s32 %s1120_s6, %s201_s13  ;;  %s1830_s2 = sld [smem:[#allocation3 + %s265_s22]] }
  0x75   :  { %1331 = vmatprep.mubr.msk.f32.mxu0 %vm1553_vm2, %v1554_v8  ;;  %s1221_s12 = sadd.s32 512, %s1220_s17  ;;  %s239_s28 = sadd.s32 %s1128_s15, %s237_s3 }
  0x76   :  { %s273_s8 = sand.u32 127, %s1753_s16  ;;  %s1833_s4 = sld [smem:[#allocation12 + %s202_s21]] }
  0x77   :  { %s274_s18 = sadd.s32 %s1221_s12, %s273_s8  ;;  %s242_s30 = sand.u32 127, %s1129_s10 }
  0x78   :  { %s1835_s20 = sld [smem:[#allocation3 + %s274_s18]]  ;;  %s1130_s14 = sshll.u32 %s239_s28, 7 }
  0x79   :  { %1385 = vmatpush3.bf16.xpose.msk.msra.mxu0 %vm1646_vm1, %v1696_v11  ;;  %s300_s13 = sshra.s32 %s1757_s7, 7  ;;  %s305_s22 = sand.u32 127, %s1757_s7 }
  0x7a   :  { %1386 = vmatprep.subr.bf16.mxu0 %v1552_v6  ;;  %s1222_s6 = sshll.u32 %s300_s13, 7  ;;  %s309_s17 = sshra.s32 %s1763_s26, 7 }
  0x7b   :  { %s1223_s16 = sadd.s32 640, %s1222_s6  ;;  %s1224_s10 = sshll.u32 %s309_s17, 7 }
  0x7c   :  { %s306_s15 = sadd.s32 %s1223_s16, %s305_s22  ;;  %s243_s3 = sadd.s32 %s1130_s14, %s242_s30 }
  0x7d   :  { %s1138_s21 = sadd.s32 4294967295, %s1830_s2  ;;  %s1225_s8 = sadd.s32 640, %s1224_s10 }
  0x7e   :  { %2293 = sst [smem:[#allocation27_spill]] %s1835_s20  ;;  %s1139_s12 = sadd.s32 4294967295, %s1835_s20 }
  0x7f   :  { %s278_s28 = sshra.s32 %s1139_s12, 7  ;;  %s1846_s18 = sld [smem:[#allocation3 + %s306_s15]] }
  0x80   :  { %s1848_s5 = sld [smem:[#allocation12 + %s243_s3]]  ;;  %s314_s7 = sand.u32 127, %s1763_s26 }
  0x81   :  { %1389 = vmatpush3.bf16.xpose.msk.msra.mxu0 %vm1646_vm1, %v1732_v14  ;;  %s280_s13 = sadd.s32 %s1138_s21, %s278_s28  ;;  %s315_s30 = sadd.s32 %s1225_s8, %s314_s7 }
  0x82   :  { %s1858_s16 = sld [smem:[#allocation3 + %s315_s30]]  ;;  %s283_s3 = sand.u32 127, %s1139_s12 }
  0x83   :  { %s1140_s26 = sshll.u32 %s280_s13, 7  ;;  %s1154_s20 = sld [smem:[#allocation9 + $0x6]] }
  0x84   :  { %s1156_s6 = sld [smem:[#allocation10 + $0x6]]  ;;  %s284_s22 = sadd.s32 %s1140_s26, %s283_s3 }
  0x85   :  { %2294 = sst [smem:[#allocation28_spill]] %s1846_s18  ;;  %s1148_s17 = sadd.s32 4294967295, %s1846_s18 }
  0x86   :  { %s1164_s19 = sld [smem:[#allocation9 + $0x7]] }
  0x87   :  { %s1882_s24 = sld [smem:[#allocation12 + %s284_s22]] }
  0x88   :  { %2295 = sst [smem:[#allocation29_spill]] %s1858_s16  ;;  %s1149_s13 = sadd.s32 4294967295, %s1858_s16 }
  0x89   :  { %s319_s29 = sshra.s32 %s1149_s13, 7  ;;  %s341_s27 = sshra.s32 %s1154_s20, 7 }
  0x8a   :  { %s321_s23 = sadd.s32 %s1148_s17, %s319_s29  ;;  %s1884_s21 = sld [smem:[#allocation10 + $0x7]] }
  0x8b   :  { %s324_s8 = sand.u32 127, %s1149_s13  ;;  %s1226_s28 = sshll.u32 %s341_s27, 7 }
  0x8c   :  { %s1150_s7 = sshll.u32 %s321_s23, 7  ;;  %s1227_s14 = sadd.s32 768, %s1226_s28 }
  0x8d   :  { %s346_s3 = sand.u32 127, %s1154_s20  ;;  %s350_s26 = sshra.s32 %s1156_s6, 7 }
  0x8e   :  { %s347_s30 = sadd.s32 %s1227_s14, %s346_s3  ;;  %s1228_s10 = sshll.u32 %s350_s26, 7 }
  0x8f   :  { %s1886_s15 = sld [smem:[#allocation3 + %s347_s30]]  ;;  %s1229_s22 = sadd.s32 768, %s1228_s10 }
  0x90   :  { %s355_s12 = sand.u32 127, %s1156_s6  ;;  %s2296_s29 = sld [smem:[#allocation24_spill]] }
  0x91   :  { %s382_s17 = sshra.s32 %s1164_s19, 7  ;;  %s356_s16 = sadd.s32 %s1229_s22, %s355_s12 }
  0x92   :  { %s1230_s13 = sshll.u32 %s382_s17, 7  ;;  %s325_s27 = sadd.s32 %s1150_s7, %s324_s8 }
  0x93   :  { %s2297_s23 = sld [smem:[#allocation20_spill]]  ;;  %s1231_s20 = sadd.s32 896, %s1230_s13 }
  0x94   :  { %s1888_s18 = sld [smem:[#allocation3 + %s356_s16]]  ;;  %s387_s28 = sand.u32 127, %s1164_s19 }
  0x95   :  { %s2298_s30 = scalar_lea.vmem %s2256_s0, %s1736_s11  ;;  %s388_s26 = sadd.s32 %s1231_s20, %s387_s28 }
  0x96   :  { %v169_v15 = vld [vmem:[%s2298_s30] sm:$0x1]  ;;  %s391_s6 = sshra.s32 %s1884_s21, 7  ;;  %s1896_s10 = sld [smem:[#allocation12 + %s325_s27]] }
  0x97   :  { %s1158_s12 = sadd.s32 4294967295, %s1886_s15  ;;  %s2299_s8 = scalar_lea.vmem %s2257_s1, %s1826_s9  ;;  %v484_v18 = vrot.slane %v169_v15, 7 }
  0x98   :  { %s2300_s16 = sld [smem:[#allocation23_spill]]  ;;  %v1111_v16 = vld [vmem:[%s2299_s8 + $0x1] sm:$0x1]  ;;  %s1232_s19 = sshll.u32 %s391_s6, 7 }
  0x99   :  { %s1904_s7 = sld [smem:[#allocation3 + %s388_s26]]  ;;  %s2301_s11 = scalar_lea.vmem %s2256_s0, %s2296_s29  ;;  %v540_v21 = vrot.slane %v1111_v16, 7 }
  0x9a   :  { %v210_v17 = vld [vmem:[%s2301_s11] sm:$0x1]  ;;  %s1233_s20 = sadd.s32 896, %s1232_s19  ;;  %s396_s28 = sand.u32 127, %s1884_s21 }
  0x9b   :  { %s2302_s30 = scalar_lea.vmem %s2256_s0, %s2297_s23  ;;  %s1159_s9 = sadd.s32 4294967295, %s1888_s18  ;;  %v487_v24 = vrot.slane %v210_v17, 6 }
  0x9c   :  { %v128_v19 = vld [vmem:[%s2302_s30] sm:$0x1]  ;;  %s397_s22 = sadd.s32 %s1233_s20, %s396_s28  ;;  %s2303_s17 = scalar_lea.vmem %s2257_s1, %s1833_s4 }
  0x9d   :  { %v1121_v20 = vld [vmem:[%s2303_s17 + $0x1] sm:$0x1]  ;;  %s360_s29 = sshra.s32 %s1159_s9, 7  ;;  %s2304_s8 = sld [smem:[#allocation28_spill]]  ;;  %v504_v25 = vsel %vm441_vm3, %v128_v19, %v484_v18 }
  0x9e   :  { %s365_s21 = sand.u32 127, %s1159_s9  ;;  %s2305_s23 = scalar_lea.vmem %s2257_s1, %s2300_s16  ;;  %v543_v27 = vrot.slane %v1121_v20, 6  ;;  %v505_v31 = vsel %vm443_vm4, %v504_v25, %v487_v24 }
  0x9f   :  { %v1101_v22 = vld [vmem:[%s2305_s23 + $0x1] sm:$0x1]  ;;  %s2306_s20 = scalar_lea.vmem %s2256_s0, %s1798_s25  ;;  %s362_s28 = sadd.s32 %s1158_s12, %s360_s29 }
  0xa0   :  { %v251_v23 = vld [vmem:[%s2306_s20] sm:$0x1]  ;;  %s1933_s27 = sld [smem:[#allocation3 + %s397_s22]]  ;;  %s1160_s4 = sshll.u32 %s362_s28, 7  ;;  %v560_v30 = vsel %vm441_vm3, %v1101_v22, %v540_v21 }
  0xa1   :  { %s2307_s16 = scalar_lea.vmem %s2257_s1, %s1848_s5  ;;  %s1076_s25 = scalar_lea.vmem %s2257_s1, %s1882_s24  ;;  %v490_v29 = vrot.slane %v251_v23, 5  ;;  %v561_v36 = vsel %vm443_vm4, %v560_v30, %v543_v27 }
  0xa2   :  { %v1131_v26 = vld [vmem:[%s2307_s16 + $0x1] sm:$0x1]  ;;  %s366_s12 = sadd.s32 %s1160_s4, %s365_s21  ;;  %s2308_s17 = scalar_lea.vmem %s2256_s0, %s1830_s2 }
  0xa3   :  { %v292_v28 = vld [vmem:[%s2308_s17] sm:$0x1]  ;;  %s332_s13 = scalar_lea.vmem %s2256_s0, %s2304_s8  ;;  %s1954_s23 = sld [smem:[#allocation12 + %s366_s12]]  ;;  %v1141_v32 = vld [vmem:[%s1076_s25 + $0x1] sm:$0x1]  ;;  %v546_v33 = vrot.slane %v1131_v26, 5  ;;  %v506_v37 = vsel %vm445_vm5, %v505_v31, %v490_v29 }
  0xa4   :  { %s1082_s21 = scalar_lea.vmem %s2257_s1, %s1896_s10  ;;  %s1168_s2 = sadd.s32 4294967295, %s1904_s7  ;;  %v333_v34 = vld [vmem:[%s332_s13] sm:$0x1]  ;;  %v493_v35 = vrot.slane %v292_v28, 4  ;;  %v549_v39 = vrot.slane %v1141_v32, 4 }
  0xa5   :  { %s373_s11 = scalar_lea.vmem %s2256_s0, %s1886_s15  ;;  %v1151_v38 = vld [vmem:[%s1082_s21 + $0x1] sm:$0x1]  ;;  %s414_s16 = scalar_lea.vmem %s2256_s0, %s1904_s7  ;;  %v496_v41 = vrot.slane %v333_v34, 3  ;;  %v562_v42 = vsel %vm445_vm5, %v561_v36, %v546_v33 }
  0xa6   :  { %s1169_s20 = sadd.s32 4294967295, %s1933_s27  ;;  %v374_v40 = vld [vmem:[%s373_s11] sm:$0x1]  ;;  %v507_v43 = vsel %vm447_vm6, %v506_v37, %v493_v35  ;;  %v552_v45 = vrot.slane %v1151_v38, 3  ;;  %v563_v48 = vsel %vm447_vm6, %v562_v42, %v549_v39  ;;  %s1096_s29 = sld [smem:[#allocation3 + $0x9]] }
  0xa7   :  { %s401_s28 = sshra.s32 %s1169_s20, 7  ;;  %s406_s4 = sand.u32 127, %s1169_s20  ;;  %v415_v46 = vld [vmem:[%s414_s16] sm:$0x1]  ;;  %v499_v47 = vrot.slane %v374_v40, 2  ;;  %v508_v49 = vsel %vm449_vm7, %v507_v43, %v496_v41 }
  0xa8   :  { %s403_s3 = sadd.s32 %s1168_s2, %s401_s28  ;;  %v502_v51 = vrot.slane %v415_v46, 1  ;;  %v564_v52 = vsel %vm449_vm7, %v563_v48, %v552_v45  ;;  %s1097_s19 = sld [smem:[#allocation7 + $0x9]] }
  0xa9   :  { %s1088_s15 = scalar_lea.vmem %s2257_s1, %s1954_s23  ;;  %s1170_s25 = sshll.u32 %s403_s3, 7  ;;  %v509_v53 = vsel %vm451_vm8, %v508_v49, %v499_v47 }
  0xaa   :  { %s407_s12 = sadd.s32 %s1170_s25, %s406_s4  ;;  %v1161_v44 = vld [vmem:[%s1088_s15 + $0x1] sm:$0x1]  ;;  %v510_v56 = vsel %vm453_vm9, %v509_v53, %v502_v51  ;;  %s1102_s13 = sld [smem:[#allocation3 + $0x89]] }
  0xab   :  { %s408_s22 = sld [smem:[#allocation12 + %s407_s12]]  ;;  %v555_v50 = vrot.slane %v1161_v44, 2 }
  0xac   :  { %s1103_s23 = sld [smem:[#allocation7 + $0x89]]  ;;  %s123_s3 = scalar_lea.vmem %s2256_s0, %s1096_s29 }
  0xad   :  { %v565_v55 = vsel %vm451_vm8, %v564_v52, %v555_v50  ;;  %s1112_s5 = sld [smem:[#allocation3 + $0x109]]  ;;  %v124_v12 = vld [vmem:[%s123_s3] sm:$0x1]  ;;  %s2313_s25 = sld [smem:[#allocation27_spill]] }
  0xae   :  { %s1113_s24 = sld [smem:[#allocation7 + $0x109]]  ;;  %s125_s16 = scalar_lea.vmem %s2257_s1, %s1097_s19 }
  0xaf   :  { %s1122_s21 = sld [smem:[#allocation3 + $0x189]]  ;;  %v126_v13 = vld [vmem:[%s125_s16] sm:$0x1]  ;;  %s2309_s16 = sld [smem:[#allocation22_spill]] }
  0xb0   :  { %s1123_s2 = sld [smem:[#allocation7 + $0x189]]  ;;  %s164_s15 = scalar_lea.vmem %s2256_s0, %s1102_s13 }
  0xb1   :  { %s1094_s17 = scalar_lea.vmem %s2257_s1, %s408_s22  ;;  %s1132_s14 = sld [smem:[#allocation3 + $0x209]]  ;;  %v165_v14 = vld [vmem:[%s164_s15] sm:$0x1] }
  0xb2   :  { %v1171_v54 = vld [vmem:[%s1094_s17 + $0x1] sm:$0x1]  ;;  %s1133_s8 = sld [smem:[#allocation7 + $0x209]]  ;;  %s166_s22 = scalar_lea.vmem %s2257_s1, %s1103_s23  ;;  %v421_v18 = vrot.slane %v165_v14, 7 }
  0xb3   :  { %v558_v57 = vrot.slane %v1171_v54, 1  ;;  %s2026_s11 = sld [smem:[#allocation3 + $0x289]]  ;;  %v167_v15 = vld [vmem:[%s166_s22] sm:$0x1]  ;;  %s205_s17 = scalar_lea.vmem %s2256_s0, %s1112_s5 }
  0xb4   :  { %s2028_s20 = sld [smem:[#allocation7 + $0x289]]  ;;  %s207_s19 = scalar_lea.vmem %s2257_s1, %s1113_s24  ;;  %v206_v16 = vld [vmem:[%s205_s17] sm:$0x1]  ;;  %v456_v19 = vrot.slane %v167_v15, 7  ;;  %v442_v27 = vsel %vm441_vm3, %v124_v12, %v421_v18 }
  0xb5   :  { %v566_v58 = vsel %vm453_vm9, %v565_v55, %v558_v57  ;;  %v208_v17 = vld [vmem:[%s207_s19] sm:$0x1]  ;;  %s246_s3 = scalar_lea.vmem %s2256_s0, %s1122_s21  ;;  %v424_v22 = vrot.slane %v206_v16, 6  ;;  %s1162_s6 = sld [smem:[#allocation3 + $0x389]] }
  0xb6   :  { %v1990_v59 = vadd.f32 %v566_v58, %v510_v56  ;;  %s248_s30 = scalar_lea.vmem %s2257_s1, %s1123_s2  ;;  %v247_v20 = vld [vmem:[%s246_s3] sm:$0x1]  ;;  %v459_v23 = vrot.slane %v208_v17, 6  ;;  %v476_v29 = vsel %vm441_vm3, %v126_v13, %v456_v19  ;;  %s2311_s24 = sld [smem:[#allocation21_spill]] }
  0xb7   :  { %v249_v21 = vld [vmem:[%s248_s30] sm:$0x1]  ;;  %s287_s9 = scalar_lea.vmem %s2256_s0, %s1132_s14  ;;  %v427_v26 = vrot.slane %v247_v20, 5  ;;  %s1152_s14 = sld [smem:[#allocation3 + $0x309]]  ;;  %v444_v32 = vsel %vm443_vm4, %v442_v27, %v424_v22 }
  0xb8   :  { %1313 = vmatmul.mubr.msk.f32.vlgmr.msra.gmra.mrb[0].mxu1 %vm567_vm0, %v1990_v59  ;;  %s289_s15 = scalar_lea.vmem %s2257_s1, %s1133_s8  ;;  %v288_v24 = vld [vmem:[%s287_s9] sm:$0x1]  ;;  %v462_v28 = vrot.slane %v249_v21, 5  ;;  %v477_v33 = vsel %vm443_vm4, %v476_v29, %v459_v23  ;;  %s1153_s8 = sld [smem:[#allocation7 + $0x309]] }
  0xb9   :  { %v290_v25 = vld [vmem:[%s289_s15] sm:$0x1]  ;;  %s328_s2 = scalar_lea.vmem %s2256_s0, %s2026_s11  ;;  %v430_v34 = vrot.slane %v288_v24, 4  ;;  %v446_v35 = vsel %vm445_vm5, %v444_v32, %v427_v26  ;;  %s1163_s11 = sld [smem:[#allocation7 + $0x389]] }
  0xba   :  { %s330_s7 = scalar_lea.vmem %s2257_s1, %s2028_s20  ;;  %v329_v30 = vld [vmem:[%s328_s2] sm:$0x1]  ;;  %v465_v36 = vrot.slane %v290_v25, 4  ;;  %v478_v37 = vsel %vm445_vm5, %v477_v33, %v462_v28  ;;  %s2310_s9 = sld [smem:[#allocation25_spill]] }
  0xbb   :  { %v331_v31 = vld [vmem:[%s330_s7] sm:$0x1]  ;;  %v433_v38 = vrot.slane %v329_v30, 3  ;;  %v448_v39 = vsel %vm447_vm6, %v446_v35, %v430_v34  ;;  %s410_s23 = scalar_lea.vmem %s2256_s0, %s1162_s6  ;;  %s170_s21 = scalar_lea.vmem %s2256_s0, %s2309_s16 }
  0xbc   :  { %v468_v40 = vrot.slane %v331_v31, 3  ;;  %v479_v41 = vsel %vm447_vm6, %v478_v37, %v465_v36  ;;  %v411_v45 = vld [vmem:[%s410_s23] sm:$0x1]  ;;  %s2314_s17 = sld [smem:[#allocation29_spill]]  ;;  %s293_s19 = scalar_lea.vmem %s2256_s0, %s2313_s25 }
  0xbd   :  { %s369_s29 = scalar_lea.vmem %s2256_s0, %s1152_s14  ;;  %v450_v43 = vsel %vm449_vm7, %v448_v39, %v433_v38  ;;  %v439_v49 = vrot.slane %v411_v45, 1  ;;  %v294_v22 = vld [vmem:[%s293_s19] sm:$0x1]  ;;  %s375_s30 = scalar_lea.vmem %s2256_s0, %s1888_s18 }
  0xbe   :  { %v370_v42 = vld [vmem:[%s369_s29] sm:$0x1]  ;;  %s371_s13 = scalar_lea.vmem %s2257_s1, %s1153_s8  ;;  %v480_v47 = vsel %vm449_vm7, %v479_v41, %v468_v40  ;;  %s129_s8 = scalar_lea.vmem %s2256_s0, %s2311_s24  ;;  %v521_v30 = vrot.slane %v294_v22, 4 }
  0xbf   :  { %v372_v44 = vld [vmem:[%s371_s13] sm:$0x1]  ;;  %s412_s5 = scalar_lea.vmem %s2257_s1, %s1163_s11  ;;  %v436_v46 = vrot.slane %v370_v42, 2  ;;  %s2312_s1 = sld [smem:[#allocation26_spill]] }
  0xc0   :  { %v413_v48 = vld [vmem:[%s412_s5] sm:$0x1]  ;;  %v471_v50 = vrot.slane %v372_v44, 2  ;;  %s211_s22 = scalar_lea.vmem %s2256_s0, %s2310_s9  ;;  %s416_s18 = scalar_lea.vmem %s2256_s0, %s1933_s27 }
  0xc1   :  { %v452_v51 = vsel %vm451_vm8, %v450_v43, %v436_v46  ;;  %v474_v52 = vrot.slane %v413_v48, 1  ;;  %v212_v13 = vld [vmem:[%s211_s22] sm:$0x1]  ;;  %s2315_s9 = sld [smem:[#allocation30_spill]] }
  0xc2   :  { %v454_v53 = vsel %vm453_vm9, %v452_v51, %v439_v49  ;;  %v481_v54 = vsel %vm451_vm8, %v480_v47, %v471_v50  ;;  %v130_v14 = vld [vmem:[%s129_s8] sm:$0x1]  ;;  %s334_s3 = scalar_lea.vmem %s2256_s0, %s2314_s17  ;;  %s1556_s17 = smov [#allocation13]  }
  0xc3   :  { %v482_v55 = vsel %vm453_vm9, %v481_v54, %v474_v52  ;;  %v335_v29 = vld [vmem:[%s334_s3] sm:$0x1]  ;;  %s1024_s29 = sshll.u32 %s1556_s17, 4  ;;  %s1025_s29 = int_to_ptr.vmem [resolvable:$true] %s1024_s29 }
  0xc4   :  { %v934_v56 = vadd.f32 %v482_v55, %v454_v53  ;;  %v376_v36 = vld [vmem:[%s375_s30] sm:$0x1]  ;;  %v524_v37 = vrot.slane %v335_v29, 3  ;;  %s1503_s28 = scalar_lea.vmem %s1025_s29, 256  ;;  %p1508_p12 = scmp.lt.s32.totalorder %s1025_s29, %s1025_s29 }
  0xc5   :  { %s252_s20 = scalar_lea.vmem %s2256_s0, %s2312_s1  ;;  %v417_v43 = vld [vmem:[%s416_s18] sm:$0x1]  ;;  %p1504_p11 = scmp.ne.s32.totalorder %s1025_s29, %s1503_s28 }
  0xc6   :  { %1332 = vmatmul.mubr.msk.f32.vlgmr.msra.gmra.mrb[8].mxu0 %vm567_vm0, %v934_v56  ;;  %v253_v19 = vld [vmem:[%s252_s20] sm:$0x1]  ;;  %v530_v47 = vrot.slane %v417_v43, 1  ;;  %s1555_s20 = smov 64   ;;  %p1509_p13 = scmp.lt.s32.totalorder %s1503_s28, %s1503_s28 }
  0xc7   :  { %v518_v25 = vrot.slane %v253_v19, 5  ;;  %v786_v19 = vld [vmem:[%s2315_s9] sm:$0xff] }
  0xc8   :  { %p1510_p0 = por %p1509_p13, %p1508_p12 }
  0xca   :  { %p1511_p1 = pnand %p1510_p0, %p1504_p11 }
 0x13b   :  { %v1994_v60 = vpop.f32.mrb[0].mxu0 }
 0x13c   :  { %v1996_v61 = vpop.f32.mrb[1].mxu0  ;;  %v701_v1 = vsel %vm697_vm10, %v1994_v60, -inf }
 0x13d   :  { %v698_v62 = vsel %vm697_vm10, %v1996_v61, -inf }
 0x13e   :  { %699 = vmax.xlane.f32.xlu0 %v698_v62 }
 0x13f   :  { %v2000_v63 = vpop.f32.mrb[2].mxu0 }
 0x140   :  { %v2002_v0 = vpop.f32.mrb[3].mxu0  ;;  %v707_v5 = vsel %vm697_vm10, %v2000_v63, -inf }
 0x141   :  { %v704_v2 = vsel %vm697_vm10, %v2002_v0, -inf }
 0x142   :  { %702 = vmax.xlane.f32.xlu0 %v701_v1  ;;  %705 = vmax.xlane.f32.xlu1 %v704_v2 }
 0x143   :  { %v2008_v3 = vpop.f32.mrb[4].mxu0 }
 0x144   :  { %v2010_v4 = vpop.f32.mrb[5].mxu0  ;;  %v713_v9 = vsel %vm697_vm10, %v2008_v3, -inf }
 0x145   :  { %v710_v6 = vsel %vm697_vm10, %v2010_v4, -inf }
 0x146   :  { %708 = vmax.xlane.f32.xlu1 %v707_v5  ;;  %711 = vmax.xlane.f32.xlu0 %v710_v6  ;;  %v171_v5 = vld [vmem:[%s170_s21] sm:$0x1] }
 0x147   :  { %v2016_v7 = vpop.f32.mrb[6].mxu0 }
 0x148   :  { %v2018_v8 = vpop.f32.mrb[7].mxu0  ;;  %v719_v11 = vsel %vm697_vm10, %v2016_v7, -inf }
 0x149   :  { %v716_v10 = vsel %vm697_vm10, %v2018_v8, -inf }
 0x14a   :  { %714 = vmax.xlane.f32.xlu1 %v713_v9  ;;  %717 = vmax.xlane.f32.xlu0 %v716_v10 }
 0x14e   :  { %720 = vmax.xlane.f32.xlu1 %v719_v11 }
 0x18b   :  { %v2095_v57 = vpop.f32.mrb[0].mxu1 }
 0x18c   :  { %v1314_v58 = vpop.f32.mrb[1].mxu1  ;;  %v903_v62 = vsel %vm697_vm10, %v2095_v57, -inf }
 0x18d   :  { %904 = vmax.xlane.f32.xlu0 %v903_v62 }
 0x1cb   :  { %v700_v1 = vpop.xlane.xlu0 %699 }
 0x1cc   :  { %v722_v2 = vsub.f32 %v1996_v61, %v700_v1  ;;  %v512_v61 = vrot.slane %v171_v5, 7 }
 0x1ce   :  { %v730_v6 = vmul.f32 1.442695, %v722_v2  ;;  %v532_v21 = vsel %vm441_vm3, %v130_v14, %v512_v61 }
 0x1cf   :  { %v703_v9 = vpop.xlane.xlu0 %702  ;;  %v706_v10 = vpop.xlane.xlu1 %705 }
 0x1d0   :  { %1407 = vpow2.f32 %v730_v6  ;;  %v723_v11 = vsub.f32 %v1994_v60, %v703_v9  ;;  %v724_v12 = vsub.f32 %v2002_v0, %v706_v10  ;;  %v515_v60 = vrot.slane %v212_v13, 6 }
 0x1d2   :  { %v732_v15 = vmul.f32 1.442695, %v723_v11  ;;  %v734_v16 = vmul.f32 1.442695, %v724_v12  ;;  %v533_v28 = vsel %vm443_vm4, %v532_v21, %v515_v60 }
 0x1d3   :  { %v709_v17 = vpop.xlane.xlu1 %708  ;;  %v712_v18 = vpop.xlane.xlu0 %711  ;;  %v534_v34 = vsel %vm445_vm5, %v533_v28, %v518_v25 }
 0x1d4   :  { %1409 = vpow2.f32 %v732_v15  ;;  %v725_v0 = vsub.f32 %v2000_v63, %v709_v17  ;;  %v726_v20 = vsub.f32 %v2010_v4, %v712_v18  ;;  %v535_v38 = vsel %vm447_vm6, %v534_v34, %v521_v30 }
 0x1d5   :  { %1411 = vpow2.f32 %v734_v16  ;;  %v536_v45 = vsel %vm449_vm7, %v535_v38, %v524_v37  ;;  %v791_v37 = vld [vmem:[%s2315_s9 + $0x28] sm:$0xff] }
 0x1d6   :  { %v736_v23 = vmul.f32 1.442695, %v725_v0  ;;  %v738_v24 = vmul.f32 1.442695, %v726_v20  ;;  %v787_v20 = vld [vmem:[%s2315_s9 + $0x8] sm:$0xff] }
 0x1d7   :  { %v715_v26 = vpop.xlane.xlu1 %714  ;;  %v718_v27 = vpop.xlane.xlu0 %717 }
 0x1d8   :  { %1413 = vpow2.f32 %v736_v23  ;;  %v727_v63 = vsub.f32 %v2008_v3, %v715_v26  ;;  %v728_v4 = vsub.f32 %v2018_v8, %v718_v27  ;;  %v788_v23 = vld [vmem:[%s2315_s9 + $0x10] sm:$0xff] }
 0x1d9   :  { %1415 = vpow2.f32 %v738_v24 }
 0x1da   :  { %v2136_v31 = vpop.eup %1407  ;;  %v740_v32 = vmul.f32 1.442695, %v727_v63  ;;  %v742_v33 = vmul.f32 1.442695, %v728_v4  ;;  %v789_v4 = vld [vmem:[%s2315_s9 + $0x18] sm:$0xff] }
 0x1db   :  { %v721_v35 = vpop.xlane.xlu1 %720  ;;  %v746_v3 = vsel %vm697_vm10, %v2136_v31, 0.0 }
 0x1dc   :  { %1417 = vpow2.f32 %v740_v32  ;;  %v729_v8 = vsub.f32 %v2016_v7, %v721_v35  ;;  %747 = vadd.xlane.f32.xlu1 %v746_v3  ;;  %v527_v7 = vrot.slane %v376_v36, 2 }
 0x1dd   :  { %1419 = vpow2.f32 %v742_v33 }
 0x1de   :  { %v2147_v39 = vpop.eup %1409  ;;  %v744_v40 = vmul.f32 1.442695, %v729_v8  ;;  %v537_v50 = vsel %vm451_vm8, %v536_v45, %v527_v7 }
 0x1df   :  { %v2149_v41 = vpop.eup %1411  ;;  %v749_v42 = vsel %vm697_vm10, %v2147_v39, 0.0  ;;  %v538_v53 = vsel %vm453_vm9, %v537_v50, %v530_v47 }
 0x1e0   :  { %1421 = vpow2.f32 %v744_v40  ;;  %v752_v44 = vsel %vm697_vm10, %v2149_v41, 0.0  ;;  %750 = vadd.xlane.f32.xlu0 %v749_v42  ;;  %v915_v58 = vmul.f32 %v1990_v59, %v538_v53  ;;  %v2182_v59 = vpop.f32.mrb[8].mxu0  ;;  %v792_v42 = vld [vmem:[%s2315_s9 + $0x30] sm:$0xff] }
 0x1e1   :  { %753 = vadd.xlane.f32.xlu1 %v752_v44  ;;  %1014 = vst.msk [vmem:[#allocation13 + $0x8] sm:$0xff] %vm697_vm10, %v2182_v59  ;;  %v1333_v12 = vpop.f32.mrb[9].mxu0 }
 0x1e2   :  { %v1414_v46 = vpop.eup %1413  ;;  %v916_v2 = vsel %vm567_vm0, %v915_v58, 0.0 }
 0x1e3   :  { %v2156_v48 = vpop.eup %1415  ;;  %v755_v49 = vsel %vm697_vm10, %v1414_v46, 0.0 }
 0x1e4   :  { %v758_v51 = vsel %vm697_vm10, %v2156_v48, 0.0  ;;  %756 = vadd.xlane.f32.xlu0 %v755_v49 }
 0x1e5   :  { %759 = vadd.xlane.f32.xlu1 %v758_v51 }
 0x1e6   :  { %v2162_v52 = vpop.eup %1417 }
 0x1e7   :  { %v2165_v54 = vpop.eup %1419  ;;  %v761_v55 = vsel %vm697_vm10, %v2162_v52, 0.0 }
 0x1e8   :  { %762 = vadd.xlane.f32.xlu0 %v761_v55  ;;  %v764_v56 = vsel %vm697_vm10, %v2165_v54, 0.0 }
 0x1e9   :  { %765 = vadd.xlane.f32.xlu1 %v764_v56 }
 0x1ea   :  { %v2172_v62 = vpop.eup %1421 }
 0x1eb   :  { %v767_v1 = vsel %vm697_vm10, %v2172_v62, 0.0 }
 0x1ec   :  { %768 = vadd.xlane.f32.xlu0 %v767_v1 }
 0x1f0   :  { %917 = vadd.xlane.f32.xlu0 %v916_v2 }
 0x21a   :  { %v2177_v5 = vpop.xlane.xlu0 %904 }
 0x21b   :  { %v906_v6 = vsub.f32 %v2095_v57, %v2177_v5 }
 0x21d   :  { %v907_v9 = vmul.f32 1.442695, %v906_v6 }
 0x21f   :  { %1423 = vpow2.f32 %v907_v9 }
 0x229   :  { %v1424_v10 = vpop.eup %1423 }
 0x22a   :  { %v909_v11 = vsel %vm697_vm10, %v1424_v10, 0.0 }
 0x22b   :  { %910 = vadd.xlane.f32.xlu1 %v909_v11 }
 0x269   :  { %v748_v13 = vpop.xlane.xlu1 %747 }
 0x26a   :  { %1425 = vrcp.f32 %v748_v13 }
 0x26d   :  { %v751_v61 = vpop.xlane.xlu0 %750 }
 0x26e   :  { %v754_v14 = vpop.xlane.xlu1 %753  ;;  %1427 = vrcp.f32 %v751_v61 }
 0x26f   :  { %1429 = vrcp.f32 %v754_v14 }
 0x271   :  { %v757_v15 = vpop.xlane.xlu0 %756 }
 0x272   :  { %v760_v57 = vpop.xlane.xlu1 %759  ;;  %1431 = vrcp.f32 %v757_v15 }
 0x273   :  { %1433 = vrcp.f32 %v760_v57 }
 0x274   :  { %v1426_v16 = vpop.eup %1425 }
 0x275   :  { %v771_v17 = vmul.f32 %v1426_v16, %v2136_v31  ;;  %v763_v18 = vpop.xlane.xlu0 %762  ;;  %v790_v31 = vld [vmem:[%s2315_s9 + $0x20] sm:$0xff] }
 0x276   :  { %v766_v60 = vpop.xlane.xlu1 %765  ;;  %1435 = vrcp.f32 %v763_v18 }
 0x277   :  { %1437 = vrcp.f32 %v766_v60  ;;  %v794_v22 = vmul.f32 %v786_v19, %v771_v17 }
 0x278   :  { %v1428_v0 = vpop.eup %1427 }
 0x279   :  { %v1430_v21 = vpop.eup %1429  ;;  %v773_v24 = vmul.f32 %v1428_v0, %v2147_v39  ;;  %v769_v25 = vpop.xlane.xlu0 %768  ;;  %v802_v32 = vsel %vm697_vm10, %v794_v22, 0.0 }
 0x27a   :  { %v775_v26 = vmul.f32 %v1430_v21, %v2149_v41  ;;  %1439 = vrcp.f32 %v769_v25 }
 0x27b   :  { %v795_v27 = vmul.f32 %v787_v20, %v773_v24 }
 0x27c   :  { %v1432_v28 = vpop.eup %1431  ;;  %v796_v63 = vmul.f32 %v788_v23, %v775_v26 }
 0x27d   :  { %v1434_v29 = vpop.eup %1433  ;;  %v777_v30 = vmul.f32 %v1432_v28, %v1414_v46  ;;  %v803_v33 = vsel %vm697_vm10, %v795_v27, 0.0  ;;  %v918_v10 = vpop.xlane.xlu0 %917 }
 0x27e   :  { %v779_v34 = vmul.f32 %v1434_v29, %v2156_v48  ;;  %v804_v35 = vadd.f32 %v803_v33, %v802_v32  ;;  %v805_v8 = vsel %vm697_vm10, %v796_v63, 0.0  ;;  %v793_v48 = vld [vmem:[%s2315_s9 + $0x38] sm:$0xff] }
 0x27f   :  { %v797_v3 = vmul.f32 %v789_v4, %v777_v30 }
 0x280   :  { %v1436_v36 = vpop.eup %1435  ;;  %v798_v38 = vmul.f32 %v790_v31, %v779_v34  ;;  %v806_v39 = vadd.f32 %v805_v8, %v804_v35 }
 0x281   :  { %v1438_v40 = vpop.eup %1437  ;;  %v781_v41 = vmul.f32 %v1436_v36, %v2162_v52  ;;  %v807_v43 = vsel %vm697_vm10, %v797_v3, 0.0 }
 0x282   :  { %v783_v7 = vmul.f32 %v1438_v40, %v2165_v54  ;;  %v808_v44 = vadd.f32 %v807_v43, %v806_v39  ;;  %v809_v46 = vsel %vm697_vm10, %v798_v38, 0.0 }
 0x283   :  { %v799_v45 = vmul.f32 %v791_v37, %v781_v41 }
 0x284   :  { %v1440_v47 = vpop.eup %1439  ;;  %v800_v49 = vmul.f32 %v792_v42, %v783_v7  ;;  %v810_v50 = vadd.f32 %v809_v46, %v808_v44 }
 0x285   :  { %v785_v51 = vmul.f32 %v1440_v47, %v2172_v62  ;;  %v811_v52 = vsel %vm697_vm10, %v799_v45, 0.0 }
 0x286   :  { %v812_v53 = vadd.f32 %v811_v52, %v810_v50  ;;  %v813_v56 = vsel %vm697_vm10, %v800_v49, 0.0 }
 0x287   :  { %v801_v55 = vmul.f32 %v793_v48, %v785_v51 }
 0x288   :  { %v814_v54 = vadd.f32 %v813_v56, %v812_v53 }
 0x289   :  { %v815_v58 = vsel %vm697_vm10, %v801_v55, 0.0 }
 0x28a   :  { %v816_v1 = vadd.f32 %v815_v58, %v814_v54 }
 0x28c   :  { %817 = vadd.xlane.f32.xlu1 %v816_v1 }
 0x29d   :  { %1009 = vrot.lane.b32.xlu1 %v2182_v59, %s1555_s20 }
 0x2b8   :  { %v911_v2 = vpop.xlane.xlu1 %910 }
 0x2b9   :  { %1441 = vlog2.f32 %v911_v2 }
 0x2c3   :  { %v1442_v6 = vpop.eup %1441 }
 0x2c4   :  { %v913_v9 = vmul.f32 0.6931472, %v1442_v6 }
 0x2c6   :  { %v914_v62 = vadd.f32 %v913_v9, %v2177_v5 }
 0x2c8   :  { %v919_v11 = vsub.f32 %v914_v62, %v918_v10 }
 0x2ca   :  { %v921_v12 = vsel %vm920_vm11, %v919_v11, 0.0 }
 0x2cb   :  { %922 = vadd.xlane.f32.xlu0 %v921_v12 }
 0x319   :  { %v818_v13 = vpop.xlane.xlu1 %817 }
 0x31a   :  { %v819_v61 = vrot.slane %v818_v13, 4 }
 0x31c   :  { %v820_v14 = vadd.f32 %v819_v61, %v818_v13 }
 0x31d   :  { %v1010_v15 = vpop.permute.xlu1 %1009 }
 0x31e   :  { %v821_v57 = vrot.slane %v820_v14, 2  ;;  %v1012_v16 = vsel %vm697_vm10, %v2182_v59, %v1010_v15 }
 0x31f   :  { %1013 = vst [vmem:[#allocation13] sm:$0xff] %v1012_v16 }
 0x320   :  { %v822_v17 = vadd.f32 %v821_v57, %v820_v14 }
 0x321   :  { %1514 = shalt.err (!%p1511_p1)
}
 0x322   :  { %s2316_s4 = sld [smem:[#allocation32_spill]] }
 0x328   :  { %s1515_s3 = scalar_lea.hbm %s2316_s4, 256 }
 0x329   :  { %p1516_p2 = scmp.ne.s32.totalorder %s2316_s4, %s1515_s3  ;;  %p1519_p3 = scmp.lt.u32.totalorder %s1515_s3, %s2316_s4 }
 0x32b   :  { %p1521_p4 = pnand %p1519_p3, %p1516_p2 }
 0x32d   :  { %1524 = shalt.err (!%p1521_p4)
}
 0x32e   :  { %1027 = dma.vmem_to_hbm [thread:$0]  %s1025_s29, 256, %s2316_s4, [#allocation4]   ;;  %v823_v5 = vrot.slane %v822_v17, 1 }
 0x32f   :  { %s2317_s24 = sld [smem:[#allocation31_spill]]  ;;  %s2318_s22 = sld [smem:[#allocation33_spill]] }
 0x330   :  { %v824_v59 = vadd.f32 %v823_v5, %v822_v17 }
 0x332   :  { %1390 = vpush %v824_v59 }
 0x335   :  { %s1525_s7 = scalar_lea.hbm %s2318_s22, 16 }
 0x336   :  { %p1526_p5 = scmp.ne.s32.totalorder %s2318_s22, %s1525_s7  ;;  %p1529_p6 = scmp.lt.u32.totalorder %s1525_s7, %s2318_s22 }
 0x338   :  { %p1531_p7 = pnand %p1529_p6, %p1526_p5 }
 0x358   :  { %v923_v18 = vpop.xlane.xlu0 %922 }
 0x359   :  { %v924_v19 = vrot.slane %v923_v18, 4 }
 0x35b   :  { %v925_v60 = vadd.f32 %v924_v19, %v923_v18 }
 0x35d   :  { %v926_v0 = vrot.slane %v925_v60, 2 }
 0x35f   :  { %v927_v20 = vadd.f32 %v926_v0, %v925_v60 }
 0x361   :  { %v928_v21 = vrot.slane %v927_v20, 1 }
 0x363   :  { %v929_v22 = vadd.f32 %v928_v21, %v927_v20  ;;  %s1391_s0 = spop %1390 }
 0x364   :  { %s827_s1 = ssub.f32 %s2317_s24, %s1391_s0 }
 0x365   :  { %1392 = vpush %v929_v22 }
 0x366   :  { %s828_s26 = smul.f32 0.15625, %s827_s1 }
 0x396   :  { %s1393_s15 = spop %1392 }
 0x397   :  { %s933_s21 = smul.f32 0.125, %s1393_s15 }
 0x399   :  { %s1015_s25 = sadd.f32 %s933_s21, %s828_s26 }
 0x39b   :  { %1017 = sst [smem:[#allocation14]] %s1015_s25 }
 0x39c   :  { %1534 = shalt.err (!%p1531_p7)
}
 0x39d   :  { %s1557_s20 = smov [#allocation14]  }
 0x39e   :  { %1035 = dma.smem_to_hbm %s1557_s20, 16, %s2318_s22, [#allocation5]  }
 0x39f   :  { %1541 = dma.done.wait [#allocation4], 256  }
 0x3a0   :  { %1542 = vsyncadd [#allocation4], 4294967040 }
 0x3a1   :  { %1543 = dma.done.wait [#allocation5], 16  }
 0x3a2   :  { %1544 = vsyncadd [#allocation5], 4294967280 }
 0x3a3   :  { %1042 = sfence }
 0x3a4   :  { %1043 = vsyncpa [#allocation4], 1 }
 0x3a5   :  { %1044 = vsyncpa [#allocation5], 1 }
 0x3a6   :  { %1045 = vsyncpa [#allocation6], 1 }
 0x3a7   :  { %1046 = vsyncpa [#allocation8], 1 }
 0x3a8   :  { %1047 = vsyncpa [#allocation11], 1 }

</bundles_post_ra>
